<compile_context>
chip_gen: v6e
topology: v6e:2x2x1
jax: 0.10.0
libtpu: 0.0.40
codegen_flags: <defaults>
</compile_context>

<pallas_src>
import functools

import numpy as np
import jax
import jax.numpy as jnp
from jax.experimental import pallas as pl
from jax.experimental.pallas import tpu as pltpu


# --------------------- one-time parameter repacking (host) -------------------

def prepare_params(params, W, *, eps=1e-5, compute_dtype=jnp.bfloat16):
    """Repack module parameters for the fused kernel. Call ONCE per param set."""
    f32 = jnp.float32
    Cin = params["w_up"].shape[0]
    Cout = params["w1"].shape[0]
    W2 = 2 * W
    L1, L2 = W2 * Cin, W2 * Cout

    # ConvTranspose2d(k=2, s=2) -> one matmul whose output rows are already
    # interleaved: bu[a*W*Cin + j*Cin + c, (2k+b)*Cin + o] = (j==k)*Wt[c,o,a,b]
    wt = params["w_up"].astype(f32)
    eye_w = jnp.eye(W, dtype=f32)
    bu = jnp.concatenate(
        [jnp.einsum("jk,cob->jckbo", eye_w, wt[:, :, a, :]).reshape(W * Cin, L1)
         for a in (0, 1)], axis=0)                                # (2*W*Cin, L1)
    bup = jnp.tile(params["b_up"].astype(f32), W2)[None, :]       # (1, L1)

    # Conv2d(3x3, pad=1): banded weights with dx baked in,
    #   block_dy[x*Ci+c, y*Co+m] = sum_dx [x == y+dx] * w[m, c, dy+1, dx+1]
    # (out-of-range y+dx has no matching x -> zero column == zero padding),
    # so the kernel only applies the dy roll + row mask.  Conv bias + eval-mode
    # BatchNorm are folded into per-lane scale/shift rows.
    def fold(w, b, gamma, beta, mean, var):
        Co, Ci = w.shape[0], w.shape[1]
        blocks = []
        for dy in (-1, 0, 1):
            blk = jnp.zeros((W2 * Ci, W2 * Co), f32)
            for dx in (-1, 0, 1):
                tap_w = w[:, :, dy + 1, dx + 1].astype(f32)        # (Co, Ci)
                shifted_eye = jnp.eye(W2, k=-dx, dtype=f32)        # [x,y]=1 iff x==y+dx
                blk = blk + jnp.einsum("xy,mc->xcym", shifted_eye, tap_w
                                       ).reshape(W2 * Ci, W2 * Co)
            blocks.append(blk)
        bw = jnp.concatenate(blocks, axis=0)                       # (3*W2*Ci, W2*Co)
        scale = gamma / jnp.sqrt(var + eps)
        shift = (b - mean) * scale + beta
        return (bw.astype(compute_dtype),
                jnp.tile(scale.astype(f32), W2)[None, :],
                jnp.tile(shift.astype(f32), W2)[None, :])

    bw1, s1, c1 = fold(params["w1"], params["b1"], params["g1"], params["be1"],
                       params["m1"], params["v1"])
    bw2, s2, c2 = fold(params["w2"], params["b2"], params["g2"], params["be2"],
                       params["m2"], params["v2"])
    return {"bu": bu.astype(compute_dtype), "bup": bup,
            "bw1": bw1, "s1": s1, "c1": c1,
            "bw2": bw2, "s2": s2, "c2": c2}


# ------------------------------- fused forward --------------------------------

@functools.partial(jax.jit, static_argnames=("batch_block",))
def up_conv_transp_conv_out(x_nchw, prepared, batch_block=2):
    N, Cin, H, W = x_nchw.shape
    H2, W2 = 2 * H, 2 * W
    L1 = W2 * Cin
    L2 = prepared["s1"].shape[1]
    Cout = L2 // W2
    assert N % batch_block == 0, "batch must be divisible by batch_block"
    G = N // batch_block                 # grid steps
    M = batch_block * H2                 # matmul rows per step (>= 128 here)
    K1 = 2 * W * Cin
    cdt = prepared["bu"].dtype           # MXU operand dtype (bf16 or f32)
    f32 = jnp.float32

    # Input: NCHW -> NHWC rows, pre-expanded so output row 2i+a is
    # [x_row_i | 0] (a=0) / [0 | x_row_i] (a=1); the parity-stacked upsample
    # weights then yield interleaved upsampled rows from a single matmul.
    x_rows = jnp.transpose(x_nchw, (0, 2, 3, 1)).reshape(N, H, 1, W * Cin)
    zeros = jnp.zeros_like(x_rows)
    xe = jnp.concatenate(
        [jnp.concatenate([x_rows, zeros], axis=3),     # even output rows
         jnp.concatenate([zeros, x_rows], axis=3)],    # odd output rows
        axis=2).reshape(G, M, K1).astype(cdt)
    # TODO(synk): at production sizes build the parity layout in-kernel (or use
    # two half-K dots + a parity select) to avoid shipping the zero half.

    def kernel(x_ref, bu_ref, bup_ref, bw1_ref, s1_ref, c1_ref,
               bw2_ref, s2_ref, c2_ref, o_ref):
        # Hoisted per-image row-border masks, shared by both conv stages.
        # Rows where the dy roll wraps across an image boundary are exactly
        # the border rows these masks zero out.
        row_in_img = jax.lax.broadcasted_iota(jnp.int32, (M, 1), 0) % H2
        mask_top = (row_in_img >= 1).astype(f32)         # dy = -1 tap validity
        mask_bot = (row_in_img <= H2 - 2).astype(f32)    # dy = +1 tap validity

        # 1) ConvTranspose2d(k=2, s=2): one MXU matmul; rows come out already
        #    interleaved -> u is the upsampled map (M, W2*Cin), lane-dense.
        u = jnp.dot(x_ref[0], bu_ref[...],
                    preferred_element_type=f32) + bup_ref[...]

        # 2) 3x3 conv (pad=1) + folded bias/BN(eval) + ReLU as ONE matmul with
        #    K = 3*L against banded weights (dx baked in host-side): only the
        #    two dy rolls (XLU) + row masks remain in-kernel.
        def conv3x3_bn_relu(src, bw_ref, s_ref, c_ref):
            up = pltpu.roll(src, 1, axis=0) * mask_top        # src row r-1
            dn = pltpu.roll(src, M - 1, axis=0) * mask_bot    # src row r+1
            taps = jnp.concatenate([up, src, dn], axis=1).astype(cdt)  # (M, 3*L)
            y = jnp.dot(taps, bw_ref[...], preferred_element_type=f32)
            return jnp.maximum(y * s_ref[...] + c_ref[...], 0.0)       # BN+ReLU

        v = conv3x3_bn_relu(u, bw1_ref, s1_ref, c1_ref)       # (M, W2*Cout)
        o = conv3x3_bn_relu(v, bw2_ref, s2_ref, c2_ref)       # (M, W2*Cout)
        o_ref[0] = o.astype(o_ref.dtype)                      # dense slab store

    # Grid-invariant operands: single-buffered (no 2x VMEM for static weights).
    def const(shape):
        return pl.BlockSpec(shape, lambda g, _s=shape: (0,) * len(_s),
                            pipeline_mode=pl.Buffered(1))

    out_rows = pl.pallas_call(
        kernel,
        out_shape=jax.ShapeDtypeStruct((G, M, L2), f32),
        grid=(G,),
        in_specs=[
            pl.BlockSpec((1, M, K1), lambda g: (g, 0, 0)),    # expanded input
            const((K1, L1)),                                  # upsample weights
            const((1, L1)),                                   # upsample bias
            const((3 * L1, L2)),                              # banded conv1 W
            const((1, L2)), const((1, L2)),                   # BN1 scale/shift
            const((3 * L2, L2)),                              # banded conv2 W
            const((1, L2)), const((1, L2)),                   # BN2 scale/shift
        ],
        out_specs=pl.BlockSpec((1, M, L2), lambda g: (g, 0, 0)),
        compiler_params=pltpu.CompilerParams(
            dimension_semantics=("parallel",),
            vmem_limit_bytes=32 * 1024 * 1024),
    )(xe, prepared["bu"], prepared["bup"], prepared["bw1"], prepared["s1"],
      prepared["c1"], prepared["bw2"], prepared["s2"], prepared["c2"])

    # (G, batch_block*H2, W2*Cout) -> NCHW for module parity.
    # TODO(synk): if the consumer accepts NHWC (and/or bf16), return the slab
    # directly and skip this transpose / halve output bandwidth.
    out = out_rows.reshape(N, H2, W2, Cout)
    return jnp.transpose(out, (0, 3, 1, 2))


# ------------------------------ pure-JAX reference ---------------------------

def reference(x_nchw, p):
    eps = 1e-5
    # ConvTranspose2d(k=2,s=2): out[n,o,2i+a,2j+b] = sum_c x[n,c,i,j]*W[c,o,a,b] + bias
    y = jnp.einsum('nchw,coab->nohawb', x_nchw, p["w_up"])
    N, Co, Hh, _, Ww, _ = y.shape
    y = y.reshape(N, Co, 2 * Hh, 2 * Ww) + p["b_up"][None, :, None, None]

    def conv_bn_relu(z, w, b, g, be, m, v):
        z = jax.lax.conv_general_dilated(
            z, w, (1, 1), ((1, 1), (1, 1)),
            dimension_numbers=('NCHW', 'OIHW', 'NCHW'))
        z = z + b[None, :, None, None]
        z = (z - m[None, :, None, None]) / jnp.sqrt(v[None, :, None, None] + eps)
        z = z * g[None, :, None, None] + be[None, :, None, None]
        return jnp.maximum(z, 0.0)

    y = conv_bn_relu(y, p["w1"], p["b1"], p["g1"], p["be1"], p["m1"], p["v1"])
    y = conv_bn_relu(y, p["w2"], p["b2"], p["g2"], p["be2"], p["m2"], p["v2"])
    return y


# ------------------------------------- main -----------------------------------

if __name__ == "__main__":
    N, Cin, Cout, H, W = 8, 4, 8, 16, 16   # H2=W2=32, lane widths 128 / 256

    key = jax.random.PRNGKey(0)
    keys = jax.random.split(key, 16)

    def rnd(k, shape, lo=-0.5, hi=0.5):
        return jax.random.uniform(k, shape, jnp.float32, lo, hi)

    params = {
        "w_up": rnd(keys[0], (Cin, Cin, 2, 2)),
        "b_up": rnd(keys[1], (Cin,)),
        "w1":   rnd(keys[2], (Cout, Cin, 3, 3)),
        "b1":   rnd(keys[3], (Cout,)),
        "g1":   rnd(keys[4], (Cout,), 0.5, 1.5),
        "be1":  rnd(keys[5], (Cout,)),
        "m1":   rnd(keys[6], (Cout,)),
        "v1":   rnd(keys[7], (Cout,), 0.5, 1.5),
        "w2":   rnd(keys[8], (Cout, Cout, 3, 3)),
        "b2":   rnd(keys[9], (Cout,)),
        "g2":   rnd(keys[10], (Cout,), 0.5, 1.5),
        "be2":  rnd(keys[11], (Cout,)),
        "m2":   rnd(keys[12], (Cout,)),
        "v2":   rnd(keys[13], (Cout,), 0.5, 1.5),
    }
    x = rnd(keys[14], (N, Cin, H, W), -1.0, 1.0)          # NCHW, like PyTorch

    ref = reference(x, params)

    # Exact-parity path (f32 MXU operands): matches the fp32 module to 1e-4.
    prep_f32 = prepare_params(params, W, compute_dtype=jnp.float32)
    out_f32 = jax.block_until_ready(
        up_conv_transp_conv_out(x, prep_f32, batch_block=4))
    np.testing.assert_allclose(np.asarray(out_f32), np.asarray(ref),
                               rtol=1e-4, atol=1e-4)

    # Fast path (default): bf16 MXU operands, tolerance gated accordingly.
    prep_bf16 = prepare_params(params, W)                 # compute_dtype=bf16
    out_bf16 = jax.block_until_ready(
        up_conv_transp_conv_out(x, prep_bf16, batch_block=4))
    np.testing.assert_allclose(np.asarray(out_bf16), np.asarray(ref),
                               rtol=5e-2, atol=5e-2)

    print("KERNEL_OK")
</pallas_src>

<mosaic_0001>
module attributes {stable_mosaic.version = 11 : i64} {
  func.func @kernel(%arg0: i32, %arg1: memref<1x128x128xf32, #tpu.memory_space<vmem>>, %arg2: memref<128x128xf32, #tpu.memory_space<vmem>>, %arg3: memref<1x128xf32, #tpu.memory_space<vmem>>, %arg4: memref<384x256xf32, #tpu.memory_space<vmem>>, %arg5: memref<1x256xf32, #tpu.memory_space<vmem>>, %arg6: memref<1x256xf32, #tpu.memory_space<vmem>>, %arg7: memref<768x256xf32, #tpu.memory_space<vmem>>, %arg8: memref<1x256xf32, #tpu.memory_space<vmem>>, %arg9: memref<1x256xf32, #tpu.memory_space<vmem>>, %arg10: memref<1x128x256xf32, #tpu.memory_space<vmem>>) attributes {dimension_semantics = [#tpu.dimension_semantics<parallel>], iteration_bounds = array<i64: 2>, scalar_prefetch = 0 : i64, scratch_operands = 0 : i64, tpu.core_type = #tpu.core_type<tc>, window_params = [{transform_indices = @transform_0, window_bounds = array<i64: 1, 128, 128>}, {pipeline_mode = #tpu.pipeline_mode<synchronous>, transform_indices = @transform_1, window_bounds = array<i64: 128, 128>}, {pipeline_mode = #tpu.pipeline_mode<synchronous>, transform_indices = @transform_2, window_bounds = array<i64: 1, 128>}, {pipeline_mode = #tpu.pipeline_mode<synchronous>, transform_indices = @transform_3, window_bounds = array<i64: 384, 256>}, {pipeline_mode = #tpu.pipeline_mode<synchronous>, transform_indices = @transform_4, window_bounds = array<i64: 1, 256>}, {pipeline_mode = #tpu.pipeline_mode<synchronous>, transform_indices = @transform_5, window_bounds = array<i64: 1, 256>}, {pipeline_mode = #tpu.pipeline_mode<synchronous>, transform_indices = @transform_6, window_bounds = array<i64: 768, 256>}, {pipeline_mode = #tpu.pipeline_mode<synchronous>, transform_indices = @transform_7, window_bounds = array<i64: 1, 256>}, {pipeline_mode = #tpu.pipeline_mode<synchronous>, transform_indices = @transform_8, window_bounds = array<i64: 1, 256>}, {transform_indices = @transform_9, window_bounds = array<i64: 1, 128, 256>}]} {
    %0 = tpu.iota {dimensions = array<i32: 0>} : vector<128x1xi32>
    %c32_i32 = arith.constant 32 : i32
    %c0_i32 = arith.constant 0 : i32
    %1 = arith.cmpi eq, %c32_i32, %c0_i32 : i32
    %c1_i32 = arith.constant 1 : i32
    %2 = arith.select %1, %c1_i32, %c32_i32 : i32
    %3 = vector.broadcast %2 : i32 to vector<128x1xi32>
    %4 = arith.remsi %0, %3 : vector<128x1xi32>
    %c0_i32_0 = arith.constant 0 : i32
    %5 = vector.broadcast %c0_i32_0 : i32 to vector<128x1xi32>
    %6 = arith.cmpi ne, %4, %5 : vector<128x1xi32>
    %c0_i32_1 = arith.constant 0 : i32
    %7 = vector.broadcast %c0_i32_1 : i32 to vector<128x1xi32>
    %8 = arith.cmpi slt, %4, %7 : vector<128x1xi32>
    %c0_i32_2 = arith.constant 0 : i32
    %9 = arith.cmpi slt, %2, %c0_i32_2 : i32
    %10 = vector.broadcast %9 : i1 to vector<128x1xi1>
    %11 = vector.broadcast %10 : vector<128x1xi1> to vector<128x1xi1>
    %12 = arith.xori %8, %11 : vector<128x1xi1>
    %13 = arith.andi %12, %6 : vector<128x1xi1>
    %14 = vector.broadcast %2 : i32 to vector<128x1xi32>
    %15 = arith.addi %4, %14 : vector<128x1xi32>
    %16 = arith.select %13, %15, %4 : vector<128x1xi1>, vector<128x1xi32>
    %c1_i32_3 = arith.constant 1 : i32
    %17 = vector.broadcast %c1_i32_3 : i32 to vector<128x1xi32>
    %18 = arith.cmpi sge, %16, %17 : vector<128x1xi32>
    %19 = arith.extui %18 : vector<128x1xi1> to vector<128x1xi32>
    %20 = arith.sitofp %19 : vector<128x1xi32> to vector<128x1xf32>
    %c30_i32 = arith.constant 30 : i32
    %21 = vector.broadcast %c30_i32 : i32 to vector<128x1xi32>
    %22 = arith.cmpi sle, %16, %21 : vector<128x1xi32>
    %23 = arith.extui %22 : vector<128x1xi1> to vector<128x1xi32>
    %24 = arith.sitofp %23 : vector<128x1xi32> to vector<128x1xf32>
    %c0 = arith.constant 0 : index
    %c0_4 = arith.constant 0 : index
    %c0_5 = arith.constant 0 : index
    %25 = vector.load %arg1[%c0, %c0_4, %c0_5] : memref<1x128x128xf32, #tpu.memory_space<vmem>>, vector<1x128x128xf32>
    %26 = vector.shape_cast %25 : vector<1x128x128xf32> to vector<128x128xf32>
    %c0_6 = arith.constant 0 : index
    %c0_7 = arith.constant 0 : index
    %27 = vector.load %arg2[%c0_6, %c0_7] : memref<128x128xf32, #tpu.memory_space<vmem>>, vector<128x128xf32>
    %cst = arith.constant dense<0.000000e+00> : vector<128x128xf32>
    %28 = tpu.matmul %26, %27, %cst {dimension_numbers = #tpu.dot_dimension_numbers<[1], [0], [0], [1], [0, 0, 1, 1], [], []>} : vector<128x128xf32>, vector<128x128xf32>, vector<128x128xf32> -> vector<128x128xf32>
    %c0_8 = arith.constant 0 : index
    %c0_9 = arith.constant 0 : index
    %29 = vector.load %arg3[%c0_8, %c0_9] : memref<1x128xf32, #tpu.memory_space<vmem>>, vector<1x128xf32>
    %30 = vector.broadcast %29 : vector<1x128xf32> to vector<128x128xf32>
    %31 = arith.addf %28, %30 : vector<128x128xf32>
    %c1_i32_10 = arith.constant 1 : i32
    %32 = tpu.dynamic_rotate %31 by %c1_i32_10 dim 0 : vector<128x128xf32>, i32 -> vector<128x128xf32>
    %33 = vector.broadcast %20 : vector<128x1xf32> to vector<128x128xf32>
    %34 = arith.mulf %32, %33 : vector<128x128xf32>
    %c127_i32 = arith.constant 127 : i32
    %35 = tpu.dynamic_rotate %31 by %c127_i32 dim 0 : vector<128x128xf32>, i32 -> vector<128x128xf32>
    %36 = vector.broadcast %24 : vector<128x1xf32> to vector<128x128xf32>
    %37 = arith.mulf %35, %36 : vector<128x128xf32>
    %38 = tpu.concatenate %34, %31, %37 in 1 : vector<128x128xf32>, vector<128x128xf32>, vector<128x128xf32> -> vector<128x384xf32>
    %c0_11 = arith.constant 0 : index
    %c0_12 = arith.constant 0 : index
    %39 = vector.load %arg4[%c0_11, %c0_12] : memref<384x256xf32, #tpu.memory_space<vmem>>, vector<384x256xf32>
    %cst_13 = arith.constant dense<0.000000e+00> : vector<128x256xf32>
    %40 = tpu.matmul %38, %39, %cst_13 {dimension_numbers = #tpu.dot_dimension_numbers<[1], [0], [0], [1], [0, 0, 1, 1], [], []>} : vector<128x384xf32>, vector<384x256xf32>, vector<128x256xf32> -> vector<128x256xf32>
    %c0_14 = arith.constant 0 : index
    %c0_15 = arith.constant 0 : index
    %41 = vector.load %arg5[%c0_14, %c0_15] : memref<1x256xf32, #tpu.memory_space<vmem>>, vector<1x256xf32>
    %42 = vector.broadcast %41 : vector<1x256xf32> to vector<128x256xf32>
    %43 = arith.mulf %40, %42 : vector<128x256xf32>
    %c0_16 = arith.constant 0 : index
    %c0_17 = arith.constant 0 : index
    %44 = vector.load %arg6[%c0_16, %c0_17] : memref<1x256xf32, #tpu.memory_space<vmem>>, vector<1x256xf32>
    %45 = vector.broadcast %44 : vector<1x256xf32> to vector<128x256xf32>
    %46 = arith.addf %43, %45 : vector<128x256xf32>
    %cst_18 = arith.constant 0.000000e+00 : f32
    %47 = vector.broadcast %cst_18 : f32 to vector<128x256xf32>
    %48 = arith.maximumf %46, %47 : vector<128x256xf32>
    %c1_i32_19 = arith.constant 1 : i32
    %49 = tpu.dynamic_rotate %48 by %c1_i32_19 dim 0 : vector<128x256xf32>, i32 -> vector<128x256xf32>
    %50 = vector.broadcast %20 : vector<128x1xf32> to vector<128x256xf32>
    %51 = arith.mulf %49, %50 : vector<128x256xf32>
    %c127_i32_20 = arith.constant 127 : i32
    %52 = tpu.dynamic_rotate %48 by %c127_i32_20 dim 0 : vector<128x256xf32>, i32 -> vector<128x256xf32>
    %53 = vector.broadcast %24 : vector<128x1xf32> to vector<128x256xf32>
    %54 = arith.mulf %52, %53 : vector<128x256xf32>
    %55 = tpu.concatenate %51, %48, %54 in 1 : vector<128x256xf32>, vector<128x256xf32>, vector<128x256xf32> -> vector<128x768xf32>
    %c0_21 = arith.constant 0 : index
    %c0_22 = arith.constant 0 : index
    %56 = vector.load %arg7[%c0_21, %c0_22] : memref<768x256xf32, #tpu.memory_space<vmem>>, vector<768x256xf32>
    %cst_23 = arith.constant dense<0.000000e+00> : vector<128x256xf32>
    %57 = tpu.matmul %55, %56, %cst_23 {dimension_numbers = #tpu.dot_dimension_numbers<[1], [0], [0], [1], [0, 0, 1, 1], [], []>} : vector<128x768xf32>, vector<768x256xf32>, vector<128x256xf32> -> vector<128x256xf32>
    %c0_24 = arith.constant 0 : index
    %c0_25 = arith.constant 0 : index
    %58 = vector.load %arg8[%c0_24, %c0_25] : memref<1x256xf32, #tpu.memory_space<vmem>>, vector<1x256xf32>
    %59 = vector.broadcast %58 : vector<1x256xf32> to vector<128x256xf32>
    %60 = arith.mulf %57, %59 : vector<128x256xf32>
    %c0_26 = arith.constant 0 : index
    %c0_27 = arith.constant 0 : index
    %61 = vector.load %arg9[%c0_26, %c0_27] : memref<1x256xf32, #tpu.memory_space<vmem>>, vector<1x256xf32>
    %62 = vector.broadcast %61 : vector<1x256xf32> to vector<128x256xf32>
    %63 = arith.addf %60, %62 : vector<128x256xf32>
    %cst_28 = arith.constant 0.000000e+00 : f32
    %64 = vector.broadcast %cst_28 : f32 to vector<128x256xf32>
    %65 = arith.maximumf %63, %64 : vector<128x256xf32>
    %c0_29 = arith.constant 0 : index
    %c0_30 = arith.constant 0 : index
    %c0_31 = arith.constant 0 : index
    %66 = vector.load %arg10[%c0_29, %c0_30, %c0_31] : memref<1x128x256xf32, #tpu.memory_space<vmem>>, vector<1x128x256xf32>
    %67 = vector.shape_cast %66 : vector<1x128x256xf32> to vector<128x256xf32>
    %68 = vector.shape_cast %65 : vector<128x256xf32> to vector<1x128x256xf32>
    tpu.vector_store %arg10[%c0_29, %c0_30, %c0_31], %68 {strides = array<i32>} : memref<1x128x256xf32, #tpu.memory_space<vmem>>, vector<1x128x256xf32>,
    return
  }
  func.func @transform_0(%arg0: i32) -> (i32, i32, i32) {
    %c0_i32 = arith.constant 0 : i32
    %c0_i32_0 = arith.constant 0 : i32
    %c0_i32_1 = arith.constant 0 : i32
    return %arg0, %c0_i32, %c0_i32_0 : i32, i32, i32
  }
  func.func @transform_1(%arg0: i32) -> (i32, i32) {
    %c0_i32 = arith.constant 0 : i32
    %c0_i32_0 = arith.constant 0 : i32
    %c0_i32_1 = arith.constant 0 : i32
    return %c0_i32, %c0_i32_0 : i32, i32
  }
  func.func @transform_2(%arg0: i32) -> (i32, i32) {
    %c0_i32 = arith.constant 0 : i32
    %c0_i32_0 = arith.constant 0 : i32
    %c0_i32_1 = arith.constant 0 : i32
    return %c0_i32, %c0_i32_0 : i32, i32
  }
  func.func @transform_3(%arg0: i32) -> (i32, i32) {
    %c0_i32 = arith.constant 0 : i32
    %c0_i32_0 = arith.constant 0 : i32
    %c0_i32_1 = arith.constant 0 : i32
    return %c0_i32, %c0_i32_0 : i32, i32
  }
  func.func @transform_4(%arg0: i32) -> (i32, i32) {
    %c0_i32 = arith.constant 0 : i32
    %c0_i32_0 = arith.constant 0 : i32
    %c0_i32_1 = arith.constant 0 : i32
    return %c0_i32, %c0_i32_0 : i32, i32
  }
  func.func @transform_5(%arg0: i32) -> (i32, i32) {
    %c0_i32 = arith.constant 0 : i32
    %c0_i32_0 = arith.constant 0 : i32
    %c0_i32_1 = arith.constant 0 : i32
    return %c0_i32, %c0_i32_0 : i32, i32
  }
  func.func @transform_6(%arg0: i32) -> (i32, i32) {
    %c0_i32 = arith.constant 0 : i32
    %c0_i32_0 = arith.constant 0 : i32
    %c0_i32_1 = arith.constant 0 : i32
    return %c0_i32, %c0_i32_0 : i32, i32
  }
  func.func @transform_7(%arg0: i32) -> (i32, i32) {
    %c0_i32 = arith.constant 0 : i32
    %c0_i32_0 = arith.constant 0 : i32
    %c0_i32_1 = arith.constant 0 : i32
    return %c0_i32, %c0_i32_0 : i32, i32
  }
  func.func @transform_8(%arg0: i32) -> (i32, i32) {
    %c0_i32 = arith.constant 0 : i32
    %c0_i32_0 = arith.constant 0 : i32
    %c0_i32_1 = arith.constant 0 : i32
    return %c0_i32, %c0_i32_0 : i32, i32
  }
  func.func @transform_9(%arg0: i32) -> (i32, i32, i32) {
    %c0_i32 = arith.constant 0 : i32
    %c0_i32_0 = arith.constant 0 : i32
    %c0_i32_1 = arith.constant 0 : i32
    return %arg0, %c0_i32, %c0_i32_0 : i32, i32, i32
  }
}

</mosaic_0001>

<bundles_post_ra>
// kernel: up_conv_transp_conv_out.1
= control target key start
LH: loop header
LB: loop body
LE: loop exit
PB: predicated region body
PF: predicated region fallthrough
CT: control target
= control target key end

     0   :  { %s2710_s30 = smov 0   ;;  %s4718_s0 = inlined_call_operand.vmem [shape: f32[2,128,128], index: 0, kind: input, shape index: {}]   ;;  %s4719_s1 = inlined_call_operand.vmem [shape: f32[128,128], index: 1, kind: input, shape index: {}]   ;;  %s4720_s2 = inlined_call_operand.vmem [shape: f32[1,128], index: 2, kind: input, shape index: {}]   ;;  %s4721_s3 = inlined_call_operand.vmem [shape: f32[384,256], index: 3, kind: input, shape index: {}]   ;;  %s4722_s4 = inlined_call_operand.vmem [shape: f32[1,256], index: 4, kind: input, shape index: {}]   ;;  %s4723_s5 = inlined_call_operand.vmem [shape: f32[1,256], index: 5, kind: input, shape index: {}]   ;;  %s4724_s6 = inlined_call_operand.vmem [shape: f32[768,256], index: 6, kind: input, shape index: {}]   ;;  %s4725_s7 = inlined_call_operand.vmem [shape: f32[1,256], index: 7, kind: input, shape index: {}]   ;;  %s4726_s8 = inlined_call_operand.vmem [shape: f32[1,256], index: 8, kind: input, shape index: {}]   ;;  %s4727_s9 = inlined_call_operand.vmem [shape: f32[2,128,256], index: 9, kind: output, shape index: {}]  }
   0x1 LB: > { %s2532_s10 = sadd.s32 4294967295, %s2657_s30   ;;  %p2536_p0 = scmp.ge.s32.totalorder %s2657_s30, 1  ;;  %s2657_s30 = sphi %s2710_s30, %s19_s30  }
   0x2   : > { %p287_p1 = scmp.lt.s32.totalorder %s2657_s30, 3 }
   0x4   : > { %p288_p2 = pnand %p2536_p0, %p287_p1 }
   0x6   : > { %291 = sbr.rel (%p288_p2) target bundleno = 869 (0x365), region = 56 }
   0xb   : > { %v669_v0 = vld [vmem:[%s4719_s1 + $0x78] sm:$0xff]  ;;  %v668_v1 = vld [vmem:[%s4719_s1 + $0x70] sm:$0xff]  ;;  %p323_p3 = scmp.lt.s32.totalorder %s2532_s10, 1  ;;  %v667_v2 = vld [vmem:[%s4719_s1 + $0x68] sm:$0xff] }
   0xc   : > { %2586 = vmatprep.subr.mxu1 %v669_v0  ;;  %v666_v3 = vld [vmem:[%s4719_s1 + $0x60] sm:$0xff]  ;;  %v665_v4 = vld [vmem:[%s4719_s1 + $0x58] sm:$0xff]  ;;  %v664_v6 = vld [vmem:[%s4719_s1 + $0x50] sm:$0xff] }
   0xd   : > { %2587 = vmatpush3.msra.mxu1 %v669_v0  ;;  %s4795_s10 = smov (!%p323_p3, %s2532_s10), 1  ;;  %v663_v7 = vld [vmem:[%s4719_s1 + $0x48] sm:$0xff]  ;;  %v662_v8 = vld [vmem:[%s4719_s1 + $0x40] sm:$0xff]  ;;  %v1015_v9 = vld [vmem:[%s4721_s3 + $0x2f8] sm:$0xff] }
   0xe   : > { %2588 = vmatprep.subr.mxu1 %v668_v1  ;;  %s2552_s19 = sshll.u32 %s4795_s10, 7  ;;  %1177 = vmatprep.subr.mxu0 %v1015_v9  ;;  %v1014_v10 = vld [vmem:[%s4721_s3 + $0x2f0] sm:$0xff]  ;;  %v1013_v11 = vld [vmem:[%s4721_s3 + $0x2e8] sm:$0xff]  ;;  %v661_v12 = vld [vmem:[%s4719_s1 + $0x38] sm:$0xff] }
   0xf   : > { %2589 = vmatpush3.msra.mxu1 %v668_v1  ;;  %s2736_s22 = scalar_lea.vmem %s4718_s0, %s2552_s19  ;;  %1178 = vmatpush1.msra.mxu0 %v1014_v10  ;;  %v1012_v13 = vld [vmem:[%s4721_s3 + $0x2e0] sm:$0xff]  ;;  %v1011_v14 = vld [vmem:[%s4721_s3 + $0x2d8] sm:$0xff]  ;;  %v1010_v15 = vld [vmem:[%s4721_s3 + $0x2d0] sm:$0xff] }
  0x10   : > { %2590 = vmatprep.subr.mxu1 %v667_v2  ;;  %v638_v5 = vld [vmem:[%s2736_s22] sm:$0xff]  ;;  %1179 = vmatprep.subr.mxu0 %v1013_v11  ;;  %v660_v16 = vld [vmem:[%s4719_s1 + $0x30] sm:$0xff]  ;;  %v1009_v17 = vld [vmem:[%s4721_s3 + $0x2c8] sm:$0xff] }
  0x11   : > { %2591 = vmatpush3.msra.mxu1 %v667_v2  ;;  %2618 = vmatprep.mubr.f32.mxu1 %v638_v5  ;;  %v1008_v18 = vld [vmem:[%s4721_s3 + $0x2c0] sm:$0xff]  ;;  %v659_v19 = vld [vmem:[%s4719_s1 + $0x28] sm:$0xff]  ;;  %v1007_v20 = vld [vmem:[%s4721_s3 + $0x2b8] sm:$0xff] }
  0x12   : > { %2592 = vmatprep.subr.mxu1 %v666_v3  ;;  %1180 = vmatpush1.msra.mxu0 %v1012_v13  ;;  %v1006_v21 = vld [vmem:[%s4721_s3 + $0x2b0] sm:$0xff]  ;;  %v658_v22 = vld [vmem:[%s4719_s1 + $0x20] sm:$0xff]  ;;  %v1005_v23 = vld [vmem:[%s4721_s3 + $0x2a8] sm:$0xff] }
  0x13   : > { %2593 = vmatpush3.msra.mxu1 %v666_v3  ;;  %1181 = vmatprep.subr.mxu0 %v1011_v14  ;;  %v1004_v24 = vld [vmem:[%s4721_s3 + $0x2a0] sm:$0xff]  ;;  %v657_v25 = vld [vmem:[%s4719_s1 + $0x18] sm:$0xff]  ;;  %v1002_v27 = vld [vmem:[%s4721_s3 + $0x290] sm:$0xff] }
  0x14   : > { %2594 = vmatprep.subr.mxu1 %v665_v4  ;;  %1182 = vmatpush1.msra.mxu0 %v1010_v15  ;;  %v1003_v26 = vld [vmem:[%s4721_s3 + $0x298] sm:$0xff]  ;;  %v656_v28 = vld [vmem:[%s4719_s1 + $0x10] sm:$0xff]  ;;  %v1001_v29 = vld [vmem:[%s4721_s3 + $0x288] sm:$0xff] }
  0x15   : > { %2595 = vmatpush3.msra.mxu1 %v665_v4  ;;  %1183 = vmatprep.subr.mxu0 %v1009_v17  ;;  %v1000_v30 = vld [vmem:[%s4721_s3 + $0x280] sm:$0xff]  ;;  %v655_v31 = vld [vmem:[%s4719_s1 + $0x8] sm:$0xff]  ;;  %v999_v32 = vld [vmem:[%s4721_s3 + $0x278] sm:$0xff] }
  0x16   : > { %2596 = vmatprep.subr.mxu1 %v664_v6  ;;  %1184 = vmatpush1.msra.mxu0 %v1008_v18  ;;  %v998_v33 = vld [vmem:[%s4721_s3 + $0x270] sm:$0xff]  ;;  %v654_v34 = vld [vmem:[%s4719_s1] sm:$0xff]  ;;  %v997_v35 = vld [vmem:[%s4721_s3 + $0x268] sm:$0xff] }
  0x17   : > { %2597 = vmatpush3.msra.mxu1 %v664_v6  ;;  %1185 = vmatprep.subr.mxu0 %v1007_v20  ;;  %v996_v36 = vld [vmem:[%s4721_s3 + $0x260] sm:$0xff]  ;;  %v639_v37 = vld [vmem:[%s2736_s22 + $0x8] sm:$0xff]  ;;  %v951_v38 = vld [vmem:[%s4721_s3 + $0xf8] sm:$0xff] }
  0x18   : > { %2598 = vmatprep.subr.mxu1 %v663_v7  ;;  %1186 = vmatpush1.msra.mxu0 %v1006_v21  ;;  %v640_v39 = vld [vmem:[%s2736_s22 + $0x10] sm:$0xff]  ;;  %v949_v41 = vld [vmem:[%s4721_s3 + $0xe8] sm:$0xff]  ;;  %v995_v42 = vld [vmem:[%s4721_s3 + $0x258] sm:$0xff] }
  0x19   : > { %2599 = vmatpush3.msra.mxu1 %v663_v7  ;;  %1187 = vmatprep.subr.mxu0 %v1005_v23  ;;  %v950_v40 = vld [vmem:[%s4721_s3 + $0xf0] sm:$0xff]  ;;  %v948_v43 = vld [vmem:[%s4721_s3 + $0xe0] sm:$0xff]  ;;  %v641_v45 = vld [vmem:[%s2736_s22 + $0x18] sm:$0xff] }
  0x1a   : > { %2600 = vmatprep.subr.mxu1 %v662_v8  ;;  %1188 = vmatpush1.msra.mxu0 %v1004_v24  ;;  %v994_v44 = vld [vmem:[%s4721_s3 + $0x250] sm:$0xff]  ;;  %v947_v46 = vld [vmem:[%s4721_s3 + $0xd8] sm:$0xff]  ;;  %v642_v47 = vld [vmem:[%s2736_s22 + $0x20] sm:$0xff] }
  0x1b   : > { %2601 = vmatpush3.msra.mxu1 %v662_v8  ;;  %1189 = vmatprep.subr.mxu0 %v1003_v26  ;;  %v946_v48 = vld [vmem:[%s4721_s3 + $0xd0] sm:$0xff]  ;;  %v945_v49 = vld [vmem:[%s4721_s3 + $0xc8] sm:$0xff]  ;;  %v944_v51 = vld [vmem:[%s4721_s3 + $0xc0] sm:$0xff] }
  0x1c   : > { %2602 = vmatprep.subr.mxu1 %v661_v12  ;;  %1190 = vmatpush1.msra.mxu0 %v1002_v27  ;;  %v993_v50 = vld [vmem:[%s4721_s3 + $0x248] sm:$0xff]  ;;  %v992_v52 = vld [vmem:[%s4721_s3 + $0x240] sm:$0xff]  ;;  %v943_v54 = vld [vmem:[%s4721_s3 + $0xb8] sm:$0xff] }
  0x1d   : > { %2603 = vmatpush3.msra.mxu1 %v661_v12  ;;  %1191 = vmatprep.subr.mxu0 %v1001_v29  ;;  %v643_v53 = vld [vmem:[%s2736_s22 + $0x28] sm:$0xff]  ;;  %v644_v55 = vld [vmem:[%s2736_s22 + $0x30] sm:$0xff]  ;;  %v940_v58 = vld [vmem:[%s4721_s3 + $0xa0] sm:$0xff] }
  0x1e   : > { %2604 = vmatprep.subr.mxu1 %v660_v16  ;;  %1192 = vmatpush1.msra.mxu0 %v1000_v30  ;;  %v942_v56 = vld [vmem:[%s4721_s3 + $0xb0] sm:$0xff]  ;;  %v941_v57 = vld [vmem:[%s4721_s3 + $0xa8] sm:$0xff]  ;;  %v645_v59 = vld [vmem:[%s2736_s22 + $0x38] sm:$0xff] }
  0x1f   : > { %2605 = vmatpush3.msra.mxu1 %v660_v16  ;;  %1193 = vmatprep.subr.mxu0 %v999_v32  ;;  %v939_v60 = vld [vmem:[%s4721_s3 + $0x98] sm:$0xff]  ;;  %v646_v61 = vld [vmem:[%s2736_s22 + $0x40] sm:$0xff]  ;;  %v938_v62 = vld [vmem:[%s4721_s3 + $0x90] sm:$0xff] }
  0x20   : > { %2606 = vmatprep.subr.mxu1 %v659_v19  ;;  %1194 = vmatpush1.msra.mxu0 %v998_v33  ;;  %v937_v63 = vld [vmem:[%s4721_s3 + $0x88] sm:$0xff]  ;;  %v936_v0 = vld [vmem:[%s4721_s3 + $0x80] sm:$0xff]  ;;  %v935_v2 = vld [vmem:[%s4721_s3 + $0x78] sm:$0xff] }
  0x21   : > { %2607 = vmatpush3.msra.mxu1 %v659_v19  ;;  %1195 = vmatprep.subr.mxu0 %v997_v35  ;;  %v647_v1 = vld [vmem:[%s2736_s22 + $0x48] sm:$0xff]  ;;  %v648_v3 = vld [vmem:[%s2736_s22 + $0x50] sm:$0xff]  ;;  %v932_v6 = vld [vmem:[%s4721_s3 + $0x60] sm:$0xff] }
  0x22   : > { %2608 = vmatprep.subr.mxu1 %v658_v22  ;;  %1196 = vmatpush1.msra.mxu0 %v996_v36  ;;  %v934_v4 = vld [vmem:[%s4721_s3 + $0x70] sm:$0xff]  ;;  %v933_v5 = vld [vmem:[%s4721_s3 + $0x68] sm:$0xff]  ;;  %v649_v7 = vld [vmem:[%s2736_s22 + $0x58] sm:$0xff] }
  0x23   : > { %2609 = vmatpush3.msra.mxu1 %v658_v22  ;;  %1197 = vmatprep.subr.mxu0 %v995_v42  ;;  %v931_v8 = vld [vmem:[%s4721_s3 + $0x58] sm:$0xff]  ;;  %v650_v9 = vld [vmem:[%s2736_s22 + $0x60] sm:$0xff]  ;;  %v930_v10 = vld [vmem:[%s4721_s3 + $0x50] sm:$0xff] }
  0x24   : > { %2610 = vmatprep.subr.mxu1 %v657_v25  ;;  %1198 = vmatpush1.msra.mxu0 %v994_v44  ;;  %v929_v11 = vld [vmem:[%s4721_s3 + $0x48] sm:$0xff]  ;;  %v928_v12 = vld [vmem:[%s4721_s3 + $0x40] sm:$0xff]  ;;  %v927_v14 = vld [vmem:[%s4721_s3 + $0x38] sm:$0xff] }
  0x25   : > { %2611 = vmatpush3.msra.mxu1 %v657_v25  ;;  %1199 = vmatprep.subr.mxu0 %v993_v50  ;;  %v651_v13 = vld [vmem:[%s2736_s22 + $0x68] sm:$0xff]  ;;  %v652_v15 = vld [vmem:[%s2736_s22 + $0x70] sm:$0xff]  ;;  %v924_v18 = vld [vmem:[%s4721_s3 + $0x20] sm:$0xff] }
  0x26   : > { %2612 = vmatprep.subr.mxu1 %v656_v28  ;;  %1200 = vmatpush1.msra.mxu0 %v992_v52  ;;  %v926_v16 = vld [vmem:[%s4721_s3 + $0x30] sm:$0xff]  ;;  %v925_v17 = vld [vmem:[%s4721_s3 + $0x28] sm:$0xff]  ;;  %v653_v19 = vld [vmem:[%s2736_s22 + $0x78] sm:$0xff]  ;;  %s2553_s22 = sshll.u32 %s4795_s10, 8 }
  0x27   : > { %2613 = vmatpush3.msra.mxu1 %v656_v28  ;;  %v923_v20 = vld [vmem:[%s4721_s3 + $0x18] sm:$0xff]  ;;  %v922_v22 = vld [vmem:[%s4721_s3 + $0x10] sm:$0xff]  ;;  %v921_v24 = vld [vmem:[%s4721_s3 + $0x8] sm:$0xff]  ;;  %s4562_s15 = scalar_lea.vmem %s4727_s9, %s2553_s22 }
  0x28   : > { %2614 = vmatprep.subr.mxu1 %v655_v31  ;;  %v991_v21 = vld [vmem:[%s4721_s3 + $0x238] sm:$0xff]  ;;  %v990_v23 = vld [vmem:[%s4721_s3 + $0x230] sm:$0xff]  ;;  %v989_v25 = vld [vmem:[%s4721_s3 + $0x228] sm:$0xff] }
  0x29   : > { %2615 = vmatpush3.msra.mxu1 %v655_v31  ;;  %1201 = vmatprep.subr.mxu0 %v991_v21  ;;  %v920_v26 = vld [vmem:[%s4721_s3] sm:$0xff]  ;;  %v983_v28 = vld [vmem:[%s4721_s3 + $0x1f8] sm:$0xff]  ;;  %v982_v30 = vld [vmem:[%s4721_s3 + $0x1f0] sm:$0xff] }
  0x2a   : > { %2616 = vmatprep.subr.mxu1 %v654_v34  ;;  %1202 = vmatpush1.msra.mxu0 %v990_v23  ;;  %v988_v27 = vld [vmem:[%s4721_s3 + $0x220] sm:$0xff]  ;;  %v987_v29 = vld [vmem:[%s4721_s3 + $0x218] sm:$0xff]  ;;  %v986_v31 = vld [vmem:[%s4721_s3 + $0x210] sm:$0xff] }
  0x2b   : > { %2617 = vmatpush3.msra.mxu1 %v654_v34  ;;  %1203 = vmatprep.subr.mxu0 %v989_v25  ;;  %v981_v32 = vld [vmem:[%s4721_s3 + $0x1e8] sm:$0xff]  ;;  %v980_v34 = vld [vmem:[%s4721_s3 + $0x1e0] sm:$0xff]  ;;  %v979_v36 = vld [vmem:[%s4721_s3 + $0x1d8] sm:$0xff] }
  0x2c   : > { %2619 = vmatmul.mubr.f32.vlgmr.msra.gmra.mxu1 %v639_v37  ;;  %1016 = vmatprep.subr.mxu1 %v951_v38  ;;  %v985_v33 = vld [vmem:[%s4721_s3 + $0x208] sm:$0xff]  ;;  %v984_v35 = vld [vmem:[%s4721_s3 + $0x200] sm:$0xff]  ;;  %v2659_v37 = vmov 0.0   ;;  %v978_v38 = vld [vmem:[%s4721_s3 + $0x1d0] sm:$0xff] }
  0x2d   : > { %2621 = vmatprep.mubr.f32.mxu1 %v640_v39  ;;  %1017 = vmatpush1.msra.mxu1 %v950_v40  ;;  %v977_v39 = vld [vmem:[%s4721_s3 + $0x1c8] sm:$0xff]  ;;  %v976_v40 = vld [vmem:[%s4721_s3 + $0x1c0] sm:$0xff]  ;;  %v974_v42 = vld [vmem:[%s4721_s3 + $0x1b0] sm:$0xff] }
  0x2e   : > { %1018 = vmatprep.subr.mxu1 %v949_v41  ;;  %1204 = vmatpush1.msra.mxu0 %v988_v27  ;;  %v975_v41 = vld [vmem:[%s4721_s3 + $0x1b8] sm:$0xff]  ;;  %v972_v44 = vld [vmem:[%s4721_s3 + $0x1a0] sm:$0xff]  ;;  %v966_v50 = vld [vmem:[%s4721_s3 + $0x170] sm:$0xff] }
  0x2f   : > { %1019 = vmatpush1.msra.mxu1 %v948_v43  ;;  %1205 = vmatprep.subr.mxu0 %v987_v29  ;;  %v973_v43 = vld [vmem:[%s4721_s3 + $0x1a8] sm:$0xff]  ;;  %v964_v52 = vld [vmem:[%s4721_s3 + $0x160] sm:$0xff] }
  0x30   : > { %2622 = vmatmul.mubr.f32.gmra.mxu1 %v641_v45  ;;  %1020 = vmatprep.subr.mxu1 %v947_v46  ;;  %v971_v45 = vld [vmem:[%s4721_s3 + $0x198] sm:$0xff]  ;;  %v970_v46 = vld [vmem:[%s4721_s3 + $0x190] sm:$0xff] }
  0x31   : > { %2624 = vmatprep.mubr.f32.mxu1 %v642_v47  ;;  %1021 = vmatpush1.msra.mxu1 %v946_v48  ;;  %v969_v47 = vld [vmem:[%s4721_s3 + $0x188] sm:$0xff]  ;;  %v968_v48 = vld [vmem:[%s4721_s3 + $0x180] sm:$0xff] }
  0x32   : > { %1022 = vmatprep.subr.mxu1 %v945_v49  ;;  %1206 = vmatpush1.msra.mxu0 %v986_v31  ;;  %v967_v49 = vld [vmem:[%s4721_s3 + $0x178] sm:$0xff] }
  0x33   : > { %1023 = vmatpush1.msra.mxu1 %v944_v51  ;;  %1207 = vmatprep.subr.mxu0 %v985_v33  ;;  %v965_v51 = vld [vmem:[%s4721_s3 + $0x168] sm:$0xff] }
  0x34   : > { %2625 = vmatmul.mubr.f32.gmra.mxu1 %v643_v53  ;;  %1024 = vmatprep.subr.mxu1 %v943_v54  ;;  %v963_v53 = vld [vmem:[%s4721_s3 + $0x158] sm:$0xff]  ;;  %v962_v54 = vld [vmem:[%s4721_s3 + $0x150] sm:$0xff] }
  0x35   : > { %2627 = vmatprep.mubr.f32.mxu1 %v644_v55  ;;  %1025 = vmatpush1.msra.mxu1 %v942_v56  ;;  %v961_v55 = vld [vmem:[%s4721_s3 + $0x148] sm:$0xff]  ;;  %v960_v56 = vld [vmem:[%s4721_s3 + $0x140] sm:$0xff] }
  0x36   : > { %1026 = vmatprep.subr.mxu1 %v941_v57  ;;  %1208 = vmatpush1.msra.mxu0 %v984_v35  ;;  %v959_v57 = vld [vmem:[%s4721_s3 + $0x138] sm:$0xff] }
  0x37   : > { %1027 = vmatpush1.msra.mxu1 %v940_v58  ;;  %1241 = vmatprep.mubr.f32.mxu0 %v2659_v37  ;;  %v958_v58 = vld [vmem:[%s4721_s3 + $0x130] sm:$0xff] }
  0x38   : > { %2628 = vmatmul.mubr.f32.gmra.mxu1 %v645_v59  ;;  %1028 = vmatprep.subr.mxu1 %v939_v60  ;;  %v957_v59 = vld [vmem:[%s4721_s3 + $0x128] sm:$0xff]  ;;  %v956_v60 = vld [vmem:[%s4721_s3 + $0x120] sm:$0xff] }
  0x39   : > { %2630 = vmatprep.mubr.f32.mxu1 %v646_v61  ;;  %1029 = vmatpush1.msra.mxu1 %v938_v62  ;;  %v955_v61 = vld [vmem:[%s4721_s3 + $0x118] sm:$0xff]  ;;  %v954_v62 = vld [vmem:[%s4721_s3 + $0x110] sm:$0xff] }
  0x3a   : > { %1030 = vmatprep.subr.mxu1 %v937_v63  ;;  %v953_v63 = vld [vmem:[%s4721_s3 + $0x108] sm:$0xff] }
  0x3b   : > { %1031 = vmatpush1.msra.mxu1 %v936_v0  ;;  %v952_v0 = vld [vmem:[%s4721_s3 + $0x100] sm:$0xff] }
  0x3c   : > { %2631 = vmatmul.mubr.f32.gmra.mxu1 %v647_v1  ;;  %1032 = vmatprep.subr.mxu1 %v935_v2  ;;  %v1745_v1 = vld [vmem:[%s4724_s6 + $0x2f8] sm:$0xff]  ;;  %v333_v2 = vlaneseq }
  0x3d   : > { %2633 = vmatprep.mubr.f32.mxu1 %v648_v3  ;;  %1033 = vmatpush1.msra.mxu1 %v934_v4  ;;  %v3085_v3 = vld [vmem:[%s4720_s2] ss:$0 sm:$0xff] }
  0x3e   : > { %1034 = vmatprep.subr.mxu1 %v933_v5  ;;  %v3087_v5 = vshrl.u32 %v333_v2, 7  ;;  %v1744_v2 = vld [vmem:[%s4724_s6 + $0x2f0] sm:$0xff] }
  0x3f   : > { %1035 = vmatpush1.msra.mxu1 %v932_v6 }
  0x40   : > { %2634 = vmatmul.mubr.f32.gmra.mxu1 %v649_v7  ;;  %1036 = vmatprep.subr.mxu1 %v931_v8  ;;  %vm887_vm0 = vcmp.lt.s32.totalorder %v3087_v5, 7  ;;  %vm838_vm4 = vcmp.lt.s32.totalorder %v3087_v5, 1 }
  0x41   : > { %2636 = vmatprep.mubr.f32.mxu1 %v650_v9  ;;  %1037 = vmatpush1.msra.mxu1 %v930_v10  ;;  %v337_v10 = vadd.s32 24, %v3087_v5 }
  0x42   : > { %1038 = vmatprep.subr.mxu1 %v929_v11 }
  0x43   : > { %1039 = vmatpush1.msra.mxu1 %v928_v12 }
  0x44   : > { %2637 = vmatmul.mubr.f32.gmra.mxu1 %v651_v13  ;;  %1040 = vmatprep.subr.mxu1 %v927_v14 }
  0x45   : > { %2639 = vmatprep.mubr.f32.mxu1 %v652_v15  ;;  %1041 = vmatpush1.msra.mxu1 %v926_v16 }
  0x46   : > { %1042 = vmatprep.subr.mxu1 %v925_v17  ;;  %v375_v17 = vand.u32 31, %v337_v10 }
  0x47   : > { %1043 = vmatpush1.msra.mxu1 %v924_v18 }
  0x48   : > { %2640 = vmatmul.mubr.f32.gmra.mxu1 %v653_v19  ;;  %1044 = vmatprep.subr.mxu1 %v923_v20  ;;  %vm593_vm1 = vcmp.le.s32.totalorder %v375_v17, 30 }
  0x49   : > { %1045 = vmatpush1.msra.mxu1 %v922_v22 }
  0x4a   : > { %1046 = vmatprep.subr.mxu1 %v921_v24 }
  0x4b   : > { %1047 = vmatpush1.msra.mxu1 %v920_v26 }
  0x4c   : > { %1048 = vmatprep.subr.mxu1 %v983_v28  ;;  %v3123_v28 = vsel %vm593_vm1, 1.0, %v2659_v37 }
  0x4d   : > { %1049 = vmatpush2.msra.mxu1 %v982_v30 }
  0x4e   : > { %1050 = vmatprep.subr.mxu1 %v981_v32 }
  0x4f   : > { %1051 = vmatpush2.msra.mxu1 %v980_v34  ;;  %v341_v34 = vadd.s32 56, %v3087_v5 }
  0x50   : > { %1052 = vmatprep.subr.mxu1 %v979_v36 }
  0x51   : > { %1053 = vmatpush2.msra.mxu1 %v978_v38 }
  0x52   : > { %1054 = vmatprep.subr.mxu1 %v977_v39 }
  0x53   : > { %1055 = vmatpush2.msra.mxu1 %v976_v40  ;;  %v403_v40 = vand.u32 31, %v341_v34 }
  0x54   : > { %1056 = vmatprep.subr.mxu1 %v975_v41 }
  0x55   : > { %1057 = vmatpush2.msra.mxu1 %v974_v42  ;;  %vm597_vm3 = vcmp.le.s32.totalorder %v403_v40, 30 }
  0x56   : > { %1058 = vmatprep.subr.mxu1 %v973_v43 }
  0x57   : > { %1059 = vmatpush2.msra.mxu1 %v972_v44  ;;  %v354_v44 = vand.u32 31, %v3087_v5 }
  0x58   : > { %1060 = vmatprep.subr.mxu1 %v971_v45 }
  0x59   : > { %1061 = vmatpush2.msra.mxu1 %v970_v46  ;;  %vm542_vm2 = vcmp.ge.s32.totalorder %v354_v44, 1  ;;  %v1737_v44 = vld [vmem:[%s4724_s6 + $0x2b8] sm:$0xff] }
  0x5a   : > { %1062 = vmatprep.subr.mxu1 %v969_v47 }
  0x5b   : > { %1063 = vmatpush2.msra.mxu1 %v968_v48 }
  0x5c   : > { %1064 = vmatprep.subr.mxu1 %v967_v49 }
  0x5d   : > { %1065 = vmatpush2.msra.mxu1 %v966_v50 }
  0x5e   : > { %1066 = vmatprep.subr.mxu1 %v965_v51 }
  0x5f   : > { %1067 = vmatpush2.msra.mxu1 %v964_v52 }
  0x60   : > { %1068 = vmatprep.subr.mxu1 %v963_v53  ;;  %v3160_v53 = vsel %vm542_vm2, 1.0, %v2659_v37 }
  0x61   : > { %1069 = vmatpush2.msra.mxu1 %v962_v54  ;;  %v3163_v54 = vsel %vm597_vm3, 1.0, %v2659_v37 }
  0x62   : > { %1070 = vmatprep.subr.mxu1 %v961_v55  ;;  %4741 = vst [vmem:[#allocation2_spill] sm:$0xff] %v3163_v54 }
  0x63   : > { %1071 = vmatpush2.msra.mxu1 %v960_v56 }
  0x64   : > { %1072 = vmatprep.subr.mxu1 %v959_v57 }
  0x65   : > { %1073 = vmatpush2.msra.mxu1 %v958_v58 }
  0x66   : > { %1074 = vmatprep.subr.mxu1 %v957_v59 }
  0x67   : > { %1075 = vmatpush2.msra.mxu1 %v956_v60 }
  0x68   : > { %1076 = vmatprep.subr.mxu1 %v955_v61 }
  0x69   : > { %1077 = vmatpush2.msra.mxu1 %v954_v62 }
  0x6a   : > { %1078 = vmatprep.subr.mxu1 %v953_v63  ;;  %v338_v63 = vadd.s32 32, %v3087_v5 }
  0x6b   : > { %1079 = vmatpush2.msra.mxu1 %v952_v0  ;;  %v345_v0 = vadd.s32 88, %v3087_v5 }
  0x6c   : > { %2003 = vmatprep.subr.mxu1 %v1745_v1 }
  0xec   : > { %v2620_v4 = vpop.f32.mrf.mxu1 }
  0xed   : > { %v3090_v6 = vadd.f32 %v2620_v4, %v3085_v3 }
  0xee   : > { %v743_v7 = vpop.f32.mrf.mxu1 }
  0xef   : > { %v3093_v8 = vadd.f32 %v3085_v3, %v743_v7  ;;  %v872_v11 = vrot.slane %v3090_v6, 1  ;;  %v823_v4 = vrot.slane %v3090_v6, 7  ;;  %v1743_v7 = vld [vmem:[%s4724_s6 + $0x2e8] sm:$0xff] }
  0xf0   : > { %v2623_v9 = vpop.f32.mrf.mxu1 }
  0xf1   : > { %v871_v12 = vrot.slane %v3093_v8, 1  ;;  %1080 = vmatprep.mubr.f32.mxu1 %v3093_v8  ;;  %v3108_v18 = vadd.f32 %v2623_v9, %v3085_v3  ;;  %v822_v55 = vrot.slane %v3093_v8, 7 }
  0xf2   : > { %v753_v13 = vpop.f32.mrf.mxu1 }
  0xf3   : > { %v3101_v14 = vadd.f32 %v3085_v3, %v753_v13  ;;  %v902_v15 = vsel %vm887_vm0, %v871_v12, %v872_v11  ;;  %v874_v24 = vrot.slane %v3108_v18, 1  ;;  %v853_v10 = vsel %vm838_vm4, %v822_v55, %v823_v4 }
  0xf4   : > { %v2626_v16 = vpop.f32.mrf.mxu1  ;;  %1242 = vmatmul.mubr.f32.vlgmr.msra.gmra.mxu0 %v902_v15  ;;  %v431_v13 = vand.u32 31, %v345_v0 }
  0xf5   : > { %v873_v19 = vrot.slane %v3101_v14, 1  ;;  %1247 = vmatprep.mubr.f32.mxu0 %v2659_v37  ;;  %v3128_v31 = vadd.f32 %v2626_v16, %v3085_v3  ;;  %v824_v15 = vrot.slane %v3101_v14, 7 }
  0xf6   : > { %v763_v20 = vpop.f32.mrf.mxu1  ;;  %vm3221_vm6 = vcmp.le.s32.totalorder %v431_v13, 30 }
  0xf7   : > { %v3113_v21 = vadd.f32 %v3085_v3, %v763_v20  ;;  %v901_v22 = vsel %vm887_vm0, %v872_v11, %v873_v19  ;;  %v900_v27 = vsel %vm887_vm0, %v873_v19, %v874_v24  ;;  %v876_v38 = vrot.slane %v3128_v31, 1  ;;  %v1741_v20 = vld [vmem:[%s4724_s6 + $0x2d8] sm:$0xff] }
  0xf8   : > { %v2629_v23 = vpop.f32.mrf.mxu1  ;;  %1248 = vmatmul.mubr.f32.gmra.mxu0 %v901_v22  ;;  %v382_v11 = vand.u32 31, %v338_v63 }
  0xf9   : > { %v875_v25 = vrot.slane %v3113_v21, 1  ;;  %1253 = vmatprep.mubr.f32.mxu0 %v2659_v37  ;;  %v3148_v46 = vadd.f32 %v2629_v23, %v3085_v3  ;;  %v1730_v23 = vld [vmem:[%s4724_s6 + $0x280] sm:$0xff] }
  0xfa   : > { %v773_v26 = vpop.f32.mrf.mxu1  ;;  %vm3217_vm5 = vcmp.ge.s32.totalorder %v382_v11, 1  ;;  %v1731_v11 = vld [vmem:[%s4724_s6 + $0x288] sm:$0xff] }
  0xfb   : > { %v899_v29 = vsel %vm887_vm0, %v874_v24, %v875_v25  ;;  %v3134_v35 = vadd.f32 %v3085_v3, %v773_v26  ;;  %v898_v43 = vsel %vm887_vm0, %v875_v25, %v876_v38  ;;  %v878_v51 = vrot.slane %v3148_v46, 1  ;;  %v1729_v24 = vld [vmem:[%s4724_s6 + $0x278] sm:$0xff] }
  0xfc   : > { %v2632_v30 = vpop.f32.mrf.mxu1  ;;  %1254 = vmatmul.mubr.f32.gmra.mxu0 %v900_v27  ;;  %v907_v33 = vmul.f32 %v3123_v28, %v899_v29  ;;  %v826_v25 = vrot.slane %v3113_v21, 7  ;;  %v852_v27 = vsel %vm838_vm4, %v823_v4, %v824_v15  ;;  %v1740_v29 = vld [vmem:[%s4724_s6 + $0x2d0] sm:$0xff]  ;;  %v3244_v34 = vsel %vm3217_vm5, 1.0, %v2659_v37 }
  0xfd   : > { %1259 = vmatprep.mubr.f32.mxu0 %v2659_v37  ;;  %v877_v41 = vrot.slane %v3134_v35, 1  ;;  %v3173_v59 = vadd.f32 %v2632_v30, %v3085_v3  ;;  %v1739_v30 = vld [vmem:[%s4724_s6 + $0x2c8] sm:$0xff]  ;;  %v829_v13 = vrot.slane %v3148_v46, 7 }
  0xfe   : > { %v783_v32 = vpop.f32.mrf.mxu1 }
  0xff   : > { %v3140_v42 = vadd.f32 %v3085_v3, %v783_v32  ;;  %v897_v49 = vsel %vm887_vm0, %v876_v38, %v877_v41  ;;  %v896_v57 = vsel %vm887_vm0, %v877_v41, %v878_v51  ;;  %v880_v9 = vrot.slane %v3173_v59, 1  ;;  %v1738_v41 = vld [vmem:[%s4724_s6 + $0x2c0] sm:$0xff] }
 0x100   : > { %v2635_v36 = vpop.f32.mrf.mxu1  ;;  %1260 = vmatmul.mubr.f32.gmra.mxu0 %v907_v33  ;;  %v825_v32 = vrot.slane %v3108_v18, 7 }
 0x101   : > { %1265 = vmatprep.mubr.f32.mxu0 %v2659_v37  ;;  %v879_v48 = vrot.slane %v3140_v42, 1  ;;  %v3213_v22 = vadd.f32 %v2635_v36, %v3085_v3  ;;  %v3249_v36 = vsel %vm3221_vm6, 1.0, %v2659_v37  ;;  %v830_v4 = vrot.slane %v3140_v42, 7 }
 0x102   : > { %v793_v39 = vpop.f32.mrf.mxu1  ;;  %4746 = vst [vmem:[#allocation3_spill] sm:$0xff] %v3249_v36  ;;  %v851_v38 = vsel %vm838_vm4, %v824_v15, %v825_v32 }
 0x103   : > { %v895_v58 = vsel %vm887_vm0, %v878_v51, %v879_v48  ;;  %v3185_v1 = vadd.f32 %v3085_v3, %v793_v39  ;;  %v894_v19 = vsel %vm887_vm0, %v879_v48, %v880_v9  ;;  %v882_v33 = vrot.slane %v3213_v22, 1 }
 0x104   : > { %v3145_v45 = vpop.f32.mrf.mxu1  ;;  %1266 = vmatmul.mubr.f32.gmra.mxu0 %v898_v43  ;;  %v911_v62 = vmul.f32 %v3163_v54, %v895_v58  ;;  %v349_v51 = vadd.s32 120, %v3087_v5 }
 0x105   : > { %1271 = vmatprep.mubr.f32.mxu0 %v2659_v37  ;;  %v881_v16 = vrot.slane %v3185_v1, 1 }
 0x106   : > { %v803_v47 = vpop.f32.mrf.mxu1 }
 0x107   : > { %v3202_v17 = vadd.f32 %v3085_v3, %v803_v47  ;;  %v892_v39 = vsel %vm887_vm0, %v881_v16, %v882_v33  ;;  %v3267_v47 = vadd.f32 %v3145_v45, %v3085_v3  ;;  %v1736_v45 = vld [vmem:[%s4724_s6 + $0x2b0] sm:$0xff] }
 0x108   : > { %v2641_v50 = vpop.f32.mrf.mxu1  ;;  %1272 = vmatmul.mubr.f32.gmra.mxu0 %v897_v49 }
 0x109   : > { %v3156_v52 = vadd.f32 %v2641_v50, %v3085_v3  ;;  %1277 = vmatprep.mubr.f32.mxu0 %v2659_v37  ;;  %v883_v26 = vrot.slane %v3202_v17, 1  ;;  %v342_v50 = vadd.s32 64, %v3087_v5  ;;  %v884_v58 = vrot.slane %v3267_v47, 1 }
 0x10a   : > { %v813_v43 = vpop.f32.mrf.mxu1 }
 0x10b   : > { %v837_v56 = vrot.slane %v3156_v52, 7  ;;  %v891_v40 = vsel %vm887_vm0, %v882_v33, %v883_v26  ;;  %v890_v0 = vsel %vm887_vm0, %v883_v26, %v884_v58  ;;  %v1727_v26 = vld [vmem:[%s4724_s6 + $0x268] sm:$0xff] }
 0x10c   : > { %1278 = vmatmul.mubr.f32.gmra.mxu0 %v896_v57  ;;  %v915_v49 = vmul.f32 %v3249_v36, %v891_v40  ;;  %v827_v57 = vrot.slane %v3128_v31, 7  ;;  %v1720_v40 = vld [vmem:[%s4724_s6 + $0x230] sm:$0xff] }
 0x10d   : > { %v854_v60 = vsel %vm838_vm4, %v837_v56, %v822_v55  ;;  %1283 = vmatprep.mubr.f32.mxu0 %v2659_v37  ;;  %v3276_v55 = vadd.f32 %v3085_v3, %v813_v43  ;;  %v410_v3 = vand.u32 31, %v342_v50  ;;  %v1716_v50 = vld [vmem:[%s4724_s6 + $0x210] sm:$0xff] }
 0x10e   : > { %v855_v61 = vmul.f32 %v3160_v53, %v854_v60  ;;  %v459_v60 = vand.u32 31, %v349_v51  ;;  %v849_v63 = vsel %vm838_vm4, %v826_v25, %v827_v57 }
 0x10f   : > { %vm550_vm7 = vcmp.ge.s32.totalorder %v410_v3, 1  ;;  %v1776_v3 = vld [vmem:[%s4724_s6 + $0x3f0] sm:$0xff] }
 0x110   : > { %1081 = vmatmul.mubr.f32.vlgmr.msra.gmra.mxu1 %v855_v61  ;;  %1284 = vmatmul.mubr.f32.gmra.mxu0 %v911_v62  ;;  %v828_v61 = vrot.slane %v3134_v35, 7  ;;  %v885_v62 = vrot.slane %v3276_v55, 1  ;;  %vm605_vm8 = vcmp.le.s32.totalorder %v459_v60, 30  ;;  %v3318_v15 = vsel %vm550_vm7, 1.0, %v2659_v37  ;;  %v1775_v60 = vld [vmem:[%s4724_s6 + $0x3e8] sm:$0xff] }
 0x111   : > { %1086 = vmatprep.mubr.f32.mxu1 %v3090_v6  ;;  %1289 = vmatprep.mubr.f32.mxu0 %v2659_v37  ;;  %v1742_v6 = vld [vmem:[%s4724_s6 + $0x2e0] sm:$0xff] }
 0x112   : > { %2004 = vmatpush1.msra.mxu1 %v1744_v2  ;;  %v1733_v2 = vld [vmem:[%s4724_s6 + $0x298] sm:$0xff] }
 0x113   : > { %2005 = vmatprep.subr.mxu1 %v1743_v7  ;;  %v886_v7 = vrot.slane %v3156_v52, 1 }
 0x114   : > { %1087 = vmatmul.mubr.f32.gmra.mxu1 %v853_v10  ;;  %1290 = vmatmul.mubr.f32.gmra.mxu0 %v894_v19  ;;  %v889_v10 = vsel %vm887_vm0, %v884_v58, %v885_v62  ;;  %v847_v19 = vsel %vm838_vm4, %v828_v61, %v829_v13 }
 0x115   : > { %1092 = vmatprep.mubr.f32.mxu1 %v3101_v14  ;;  %1295 = vmatprep.mubr.f32.mxu0 %v2659_v37  ;;  %v893_v14 = vsel %vm887_vm0, %v880_v9, %v881_v16  ;;  %v848_v9 = vsel %vm838_vm4, %v827_v57, %v828_v61  ;;  %v3321_v16 = vsel %vm605_vm8, 1.0, %v2659_v37  ;;  %v1714_v57 = vld [vmem:[%s4724_s6 + $0x200] sm:$0xff]  ;;  %v835_v61 = vrot.slane %v3267_v47, 7 }
 0x116   : > { %2006 = vmatpush1.msra.mxu1 %v1742_v6  ;;  %4747 = vst [vmem:[#allocation4_spill] sm:$0xff] %v3321_v16  ;;  %v888_v6 = vsel %vm887_vm0, %v885_v62, %v886_v7  ;;  %v1773_v62 = vld [vmem:[%s4724_s6 + $0x3d8] sm:$0xff] }
 0x117   : > { %2007 = vmatprep.subr.mxu1 %v1741_v20  ;;  %v846_v20 = vsel %vm838_vm4, %v829_v13, %v830_v4 }
 0x118   : > { %1093 = vmatmul.mubr.f32.gmra.mxu1 %v852_v27  ;;  %1296 = vmatmul.mubr.f32.gmra.mxu0 %v893_v14  ;;  %v863_v8 = vmul.f32 %v3318_v15, %v846_v20  ;;  %v1726_v27 = vld [vmem:[%s4724_s6 + $0x260] sm:$0xff]  ;;  %v831_v14 = vrot.slane %v3173_v59, 7  ;;  %v1761_v20 = vld [vmem:[%s4724_s6 + $0x378] sm:$0xff] }
 0x119   : > { %1098 = vmatprep.mubr.f32.mxu1 %v3108_v18  ;;  %1301 = vmatprep.mubr.f32.mxu0 %v2659_v37  ;;  %v850_v18 = vsel %vm838_vm4, %v825_v32, %v826_v25  ;;  %v832_v32 = vrot.slane %v3185_v1, 7 }
 0x11a   : > { %2008 = vmatpush1.msra.mxu1 %v1740_v29  ;;  %v859_v48 = vmul.f32 %v3244_v34, %v850_v18  ;;  %v1725_v29 = vld [vmem:[%s4724_s6 + $0x258] sm:$0xff]  ;;  %v845_v33 = vsel %vm838_vm4, %v830_v4, %v831_v14 }
 0x11b   : > { %2009 = vmatprep.subr.mxu1 %v1739_v30  ;;  %v1724_v30 = vld [vmem:[%s4724_s6 + $0x250] sm:$0xff]  ;;  %v1721_v18 = vld [vmem:[%s4724_s6 + $0x238] sm:$0xff]  ;;  %v844_v43 = vsel %vm838_vm4, %v831_v14, %v832_v32 }
 0x11c   : > { %1099 = vmatmul.mubr.f32.gmra.mxu1 %v851_v38  ;;  %1302 = vmatmul.mubr.f32.gmra.mxu0 %v892_v39  ;;  %v1722_v39 = vld [vmem:[%s4724_s6 + $0x240] sm:$0xff]  ;;  %v1769_v4 = vld [vmem:[%s4724_s6 + $0x3b8] sm:$0xff] }
 0x11d   : > { %1104 = vmatprep.mubr.f32.mxu1 %v3113_v21  ;;  %1307 = vmatprep.mubr.f32.mxu0 %v2659_v37  ;;  %v1735_v21 = vld [vmem:[%s4724_s6 + $0x2a8] sm:$0xff]  ;;  %v1749_v14 = vld [vmem:[%s4724_s6 + $0x318] sm:$0xff] }
 0x11e   : > { %2010 = vmatpush1.msra.mxu1 %v1738_v41  ;;  %v834_v41 = vrot.slane %v3202_v17, 7 }
 0x11f   : > { %2011 = vmatprep.subr.mxu1 %v1737_v44  ;;  %v1718_v44 = vld [vmem:[%s4724_s6 + $0x220] sm:$0xff] }
 0x120   : > { %1105 = vmatmul.mubr.f32.gmra.mxu1 %v859_v48  ;;  %1308 = vmatmul.mubr.f32.gmra.mxu0 %v915_v49  ;;  %v833_v48 = vrot.slane %v3213_v22, 7  ;;  %v1717_v49 = vld [vmem:[%s4724_s6 + $0x218] sm:$0xff] }
 0x121   : > { %1110 = vmatprep.mubr.f32.mxu1 %v3128_v31  ;;  %1313 = vmatprep.mubr.f32.mxu0 %v2659_v37  ;;  %v1734_v31 = vld [vmem:[%s4724_s6 + $0x2a0] sm:$0xff] }
 0x122   : > { %2012 = vmatpush1.msra.mxu1 %v1736_v45  ;;  %v843_v51 = vsel %vm838_vm4, %v832_v32, %v833_v48  ;;  %v1746_v32 = vld [vmem:[%s4724_s6 + $0x300] sm:$0xff] }
 0x123   : > { %2013 = vmatprep.subr.mxu1 %v1735_v21  ;;  %v842_v21 = vsel %vm838_vm4, %v833_v48, %v834_v41  ;;  %v1671_v48 = vld [vmem:[%s4724_s6 + $0xa8] sm:$0xff] }
 0x124   : > { %1111 = vmatmul.mubr.f32.gmra.mxu1 %v849_v63  ;;  %1314 = vmatmul.mubr.f32.gmra.mxu0 %v890_v0  ;;  %v1772_v63 = vld [vmem:[%s4724_s6 + $0x3d0] sm:$0xff]  ;;  %v836_v0 = vrot.slane %v3276_v55, 7 }
 0x125   : > { %1116 = vmatprep.mubr.f32.mxu1 %v3134_v35  ;;  %1319 = vmatprep.mubr.f32.mxu0 %v2659_v37  ;;  %v1732_v35 = vld [vmem:[%s4724_s6 + $0x290] sm:$0xff] }
 0x126   : > { %2014 = vmatpush1.msra.mxu1 %v1734_v31  ;;  %v841_v31 = vsel %vm838_vm4, %v834_v41, %v835_v61  ;;  %v839_v13 = vsel %vm838_vm4, %v836_v0, %v837_v56  ;;  %v1759_v56 = vld [vmem:[%s4724_s6 + $0x368] sm:$0xff] }
 0x127   : > { %2015 = vmatprep.subr.mxu1 %v1733_v2  ;;  %v1770_v2 = vld [vmem:[%s4724_s6 + $0x3c0] sm:$0xff]  ;;  %v1675_v41 = vld [vmem:[%s4724_s6 + $0xc8] sm:$0xff] }
 0x128   : > { %1117 = vmatmul.mubr.f32.gmra.mxu1 %v848_v9  ;;  %1320 = vmatmul.mubr.f32.gmra.mxu0 %v889_v10  ;;  %v840_v9 = vsel %vm838_vm4, %v835_v61, %v836_v0  ;;  %v1767_v10 = vld [vmem:[%s4724_s6 + $0x3a8] sm:$0xff]  ;;  %v1656_v0 = vld [vmem:[%s4724_s6 + $0x30] sm:$0xff] }
 0x129   : > { %1122 = vmatprep.mubr.f32.mxu1 %v3148_v46  ;;  %1325 = vmatprep.mubr.f32.mxu0 %v2659_v37  ;;  %v903_v46 = vsel %vm887_vm0, %v886_v7, %v871_v12  ;;  %v1728_v12 = vld [vmem:[%s4724_s6 + $0x270] sm:$0xff]  ;;  %v1659_v61 = vld [vmem:[%s4724_s6 + $0x48] sm:$0xff] }
 0x12a   : > { %2016 = vmatpush1.msra.mxu1 %v1732_v35  ;;  %v919_v25 = vmul.f32 %v3321_v16, %v903_v46  ;;  %v1768_v7 = vld [vmem:[%s4724_s6 + $0x3b0] sm:$0xff]  ;;  %v1765_v35 = vld [vmem:[%s4724_s6 + $0x398] sm:$0xff]  ;;  %v1758_v46 = vld [vmem:[%s4724_s6 + $0x360] sm:$0xff] }
 0x12b   : > { %2017 = vmatprep.subr.mxu1 %v1731_v11  ;;  %v1764_v11 = vld [vmem:[%s4724_s6 + $0x390] sm:$0xff] }
 0x12c   : > { %1123 = vmatmul.mubr.f32.gmra.mxu1 %v847_v19  ;;  %1326 = vmatmul.mubr.f32.gmra.mxu0 %v888_v6  ;;  %v1763_v19 = vld [vmem:[%s4724_s6 + $0x388] sm:$0xff]  ;;  %v1762_v6 = vld [vmem:[%s4724_s6 + $0x380] sm:$0xff] }
 0x12d   : > { %1128 = vmatprep.mubr.f32.mxu1 %v3140_v42  ;;  %1331 = vmatprep.mubr.f32.mxu0 %v2659_v37  ;;  %v346_v42 = vadd.s32 96, %v3087_v5 }
 0x12e   : > { %2018 = vmatpush1.msra.mxu1 %v1730_v23  ;;  %v1757_v23 = vld [vmem:[%s4724_s6 + $0x358] sm:$0xff] }
 0x12f   : > { %2019 = vmatprep.subr.mxu1 %v1729_v24  ;;  %v438_v38 = vand.u32 31, %v346_v42  ;;  %v1756_v24 = vld [vmem:[%s4724_s6 + $0x350] sm:$0xff]  ;;  %v1751_v42 = vld [vmem:[%s4724_s6 + $0x328] sm:$0xff] }
 0x130   : > { %1129 = vmatmul.mubr.f32.gmra.mxu1 %v863_v8  ;;  %1332 = vmatmul.mubr.f32.gmra.mxu0 %v919_v25  ;;  %v1755_v8 = vld [vmem:[%s4724_s6 + $0x348] sm:$0xff]  ;;  %v1754_v25 = vld [vmem:[%s4724_s6 + $0x340] sm:$0xff] }
 0x131   : > { %1134 = vmatprep.mubr.f32.mxu1 %v3173_v59  ;;  %2020 = vmatpush1.msra.mxu1 %v1728_v12  ;;  %v1723_v59 = vld [vmem:[%s4724_s6 + $0x248] sm:$0xff]  ;;  %vm554_vm9 = vcmp.ge.s32.totalorder %v438_v38, 1  ;;  %v1753_v12 = vld [vmem:[%s4724_s6 + $0x338] sm:$0xff] }
 0x132   : > { %2021 = vmatprep.subr.mxu1 %v1727_v26  ;;  %v3397_v45 = vsel %vm554_vm9, 1.0, %v2659_v37  ;;  %v1777_v37 = vld [vmem:[%s4724_s6 + $0x3f8] sm:$0xff]  ;;  %v1752_v26 = vld [vmem:[%s4724_s6 + $0x330] sm:$0xff]  ;;  %v1679_v38 = vld [vmem:[%s4724_s6 + $0xe8] sm:$0xff] }
 0x133   : > { %2022 = vmatpush1.msra.mxu1 %v1726_v27  ;;  %v867_v58 = vmul.f32 %v3397_v45, %v842_v21  ;;  %v1750_v27 = vld [vmem:[%s4724_s6 + $0x320] sm:$0xff]  ;;  %v1667_v21 = vld [vmem:[%s4724_s6 + $0x88] sm:$0xff] }
 0x134   : > { %1135 = vmatmul.mubr.f32.gmra.mxu1 %v845_v33  ;;  %2023 = vmatprep.subr.mxu1 %v1725_v29  ;;  %v1748_v29 = vld [vmem:[%s4724_s6 + $0x310] sm:$0xff]  ;;  %v1681_v33 = vld [vmem:[%s4724_s6 + $0xf8] sm:$0xff] }
 0x135   : > { %1140 = vmatprep.mubr.f32.mxu1 %v3185_v1  ;;  %2024 = vmatpush1.msra.mxu1 %v1724_v30  ;;  %v1719_v1 = vld [vmem:[%s4724_s6 + $0x228] sm:$0xff] }
 0x136   : > { %2025 = vmatprep.subr.mxu1 %v1723_v59  ;;  %v1747_v30 = vld [vmem:[%s4724_s6 + $0x308] sm:$0xff]  ;;  %1842 = vmatprep.subr.mxu0 %v1681_v33  ;;  %v1680_v59 = vld [vmem:[%s4724_s6 + $0xf0] sm:$0xff]  ;;  %v1690_v33 = vld [vmem:[%s4724_s6 + $0x140] sm:$0xff] }
 0x137   : > { %2026 = vmatpush1.msra.mxu1 %v1722_v39  ;;  %1843 = vmatpush1.msra.mxu0 %v1680_v59  ;;  %v1678_v39 = vld [vmem:[%s4724_s6 + $0xe0] sm:$0xff]  ;;  %v1689_v59 = vld [vmem:[%s4724_s6 + $0x138] sm:$0xff] }
 0x138   : > { %1141 = vmatmul.mubr.f32.gmra.mxu1 %v844_v43  ;;  %2027 = vmatprep.subr.mxu1 %v1721_v18  ;;  %v1677_v18 = vld [vmem:[%s4724_s6 + $0xd8] sm:$0xff]  ;;  %v1674_v43 = vld [vmem:[%s4724_s6 + $0xc0] sm:$0xff] }
 0x139   : > { %1146 = vmatprep.mubr.f32.mxu1 %v3213_v22  ;;  %2028 = vmatpush1.msra.mxu1 %v1720_v40  ;;  %v1715_v22 = vld [vmem:[%s4724_s6 + $0x208] sm:$0xff]  ;;  %v1676_v40 = vld [vmem:[%s4724_s6 + $0xd0] sm:$0xff] }
 0x13a   : > { %2029 = vmatprep.subr.mxu1 %v1719_v1  ;;  %1844 = vmatprep.subr.mxu0 %v1679_v38  ;;  %v1673_v1 = vld [vmem:[%s4724_s6 + $0xb8] sm:$0xff]  ;;  %v1688_v38 = vld [vmem:[%s4724_s6 + $0x130] sm:$0xff] }
 0x13b   : > { %2030 = vmatpush1.msra.mxu1 %v1718_v44  ;;  %1845 = vmatpush1.msra.mxu0 %v1678_v39  ;;  %v1672_v44 = vld [vmem:[%s4724_s6 + $0xb0] sm:$0xff]  ;;  %v1687_v39 = vld [vmem:[%s4724_s6 + $0x128] sm:$0xff] }
 0x13c   : > { %1147 = vmatmul.mubr.f32.gmra.mxu1 %v843_v51  ;;  %2031 = vmatprep.subr.mxu1 %v1717_v49  ;;  %v1670_v49 = vld [vmem:[%s4724_s6 + $0xa0] sm:$0xff]  ;;  %v1668_v51 = vld [vmem:[%s4724_s6 + $0x90] sm:$0xff] }
 0x13d   : > { %1152 = vmatprep.mubr.f32.mxu1 %v3202_v17  ;;  %2032 = vmatpush1.msra.mxu1 %v1716_v50  ;;  %v1774_v17 = vld [vmem:[%s4724_s6 + $0x3e0] sm:$0xff]  ;;  %v1669_v50 = vld [vmem:[%s4724_s6 + $0x98] sm:$0xff] }
 0x13e   : > { %2033 = vmatprep.subr.mxu1 %v1715_v22  ;;  %1846 = vmatprep.subr.mxu0 %v1677_v18  ;;  %v1666_v22 = vld [vmem:[%s4724_s6 + $0x80] sm:$0xff] }
 0x13f   : > { %2034 = vmatpush1.msra.mxu1 %v1714_v57  ;;  %1847 = vmatpush1.msra.mxu0 %v1676_v40  ;;  %v1665_v57 = vld [vmem:[%s4724_s6 + $0x78] sm:$0xff]  ;;  %v1686_v18 = vld [vmem:[%s4724_s6 + $0x120] sm:$0xff] }
 0x140   : > { %1153 = vmatmul.mubr.f32.gmra.mxu1 %v867_v58  ;;  %2035 = vmatprep.subr.mxu1 %v1777_v37  ;;  %v1664_v37 = vld [vmem:[%s4724_s6 + $0x70] sm:$0xff]  ;;  %v1663_v58 = vld [vmem:[%s4724_s6 + $0x68] sm:$0xff]  ;;  %v1685_v40 = vld [vmem:[%s4724_s6 + $0x118] sm:$0xff] }
 0x141   : > { %1158 = vmatprep.mubr.f32.mxu1 %v3267_v47  ;;  %2036 = vmatpush2.msra.mxu1 %v1776_v3  ;;  %v1771_v47 = vld [vmem:[%s4724_s6 + $0x3c8] sm:$0xff]  ;;  %v1662_v3 = vld [vmem:[%s4724_s6 + $0x60] sm:$0xff] }
 0x142   : > { %2037 = vmatprep.subr.mxu1 %v1775_v60  ;;  %1848 = vmatprep.subr.mxu0 %v1675_v41  ;;  %v1661_v60 = vld [vmem:[%s4724_s6 + $0x58] sm:$0xff]  ;;  %v1684_v41 = vld [vmem:[%s4724_s6 + $0x110] sm:$0xff] }
 0x143   : > { %2038 = vmatpush2.msra.mxu1 %v1774_v17  ;;  %1849 = vmatpush1.msra.mxu0 %v1674_v43  ;;  %v1660_v17 = vld [vmem:[%s4724_s6 + $0x50] sm:$0xff]  ;;  %v1683_v43 = vld [vmem:[%s4724_s6 + $0x108] sm:$0xff] }
 0x144   : > { %1159 = vmatmul.mubr.f32.gmra.mxu1 %v841_v31  ;;  %2039 = vmatprep.subr.mxu1 %v1773_v62  ;;  %v1658_v62 = vld [vmem:[%s4724_s6 + $0x40] sm:$0xff]  ;;  %v1655_v31 = vld [vmem:[%s4724_s6 + $0x28] sm:$0xff] }
 0x145   : > { %1164 = vmatprep.mubr.f32.mxu1 %v3276_v55  ;;  %2040 = vmatpush2.msra.mxu1 %v1772_v63  ;;  %v1766_v55 = vld [vmem:[%s4724_s6 + $0x3a0] sm:$0xff]  ;;  %v1657_v63 = vld [vmem:[%s4724_s6 + $0x38] sm:$0xff] }
 0x146   : > { %2041 = vmatprep.subr.mxu1 %v1771_v47  ;;  %1850 = vmatprep.subr.mxu0 %v1673_v1  ;;  %v1654_v47 = vld [vmem:[%s4724_s6 + $0x20] sm:$0xff] }
 0x147   : > { %2042 = vmatpush2.msra.mxu1 %v1770_v2  ;;  %1851 = vmatpush1.msra.mxu0 %v1672_v44  ;;  %v1653_v2 = vld [vmem:[%s4724_s6 + $0x18] sm:$0xff]  ;;  %v1682_v1 = vld [vmem:[%s4724_s6 + $0x100] sm:$0xff] }
 0x148   : > { %1165 = vmatmul.mubr.f32.gmra.mxu1 %v840_v9  ;;  %2043 = vmatprep.subr.mxu1 %v1769_v4  ;;  %v1652_v4 = vld [vmem:[%s4724_s6 + $0x10] sm:$0xff]  ;;  %v1650_v9 = vld [vmem:[%s4724_s6] sm:$0xff]  ;;  %v1809_v44 = vld [vmem:[%s4724_s6 + $0x4f8] sm:$0xff] }
 0x149   : > { %1170 = vmatprep.mubr.f32.mxu1 %v3156_v52  ;;  %2044 = vmatpush2.msra.mxu1 %v1768_v7  ;;  %v1760_v52 = vld [vmem:[%s4724_s6 + $0x370] sm:$0xff]  ;;  %v1651_v7 = vld [vmem:[%s4724_s6 + $0x8] sm:$0xff] }
 0x14a   : > { %2045 = vmatprep.subr.mxu1 %v1767_v10  ;;  %1852 = vmatprep.subr.mxu0 %v1671_v48  ;;  %v1713_v10 = vld [vmem:[%s4724_s6 + $0x1f8] sm:$0xff] }
 0x14b   : > { %2046 = vmatpush2.msra.mxu1 %v1766_v55  ;;  %1853 = vmatpush1.msra.mxu0 %v1670_v49  ;;  %v1712_v55 = vld [vmem:[%s4724_s6 + $0x1f0] sm:$0xff] }
 0x14c   : > { %1171 = vmatmul.mubr.f32.gmra.mxu1 %v839_v13  ;;  %2047 = vmatprep.subr.mxu1 %v1765_v35  ;;  %v1711_v35 = vld [vmem:[%s4724_s6 + $0x1e8] sm:$0xff]  ;;  %v1709_v13 = vld [vmem:[%s4724_s6 + $0x1d8] sm:$0xff] }
 0x14d   : > { %2048 = vmatpush2.msra.mxu1 %v1764_v11  ;;  %1854 = vmatprep.subr.mxu0 %v1669_v50  ;;  %v1710_v11 = vld [vmem:[%s4724_s6 + $0x1e0] sm:$0xff] }
 0x14e   : > { %2049 = vmatprep.subr.mxu1 %v1763_v19  ;;  %1855 = vmatpush1.msra.mxu0 %v1668_v51  ;;  %v1708_v19 = vld [vmem:[%s4724_s6 + $0x1d0] sm:$0xff] }
 0x14f   : > { %2050 = vmatpush2.msra.mxu1 %v1762_v6  ;;  %1856 = vmatprep.subr.mxu0 %v1667_v21  ;;  %v1707_v6 = vld [vmem:[%s4724_s6 + $0x1c8] sm:$0xff] }
 0x150   : > { %2051 = vmatprep.subr.mxu1 %v1761_v20  ;;  %1857 = vmatpush1.msra.mxu0 %v1666_v22  ;;  %v1706_v20 = vld [vmem:[%s4724_s6 + $0x1c0] sm:$0xff] }
 0x151   : > { %2052 = vmatpush2.msra.mxu1 %v1760_v52  ;;  %1858 = vmatprep.subr.mxu0 %v1665_v57  ;;  %v1705_v52 = vld [vmem:[%s4724_s6 + $0x1b8] sm:$0xff] }
 0x152   : > { %2053 = vmatprep.subr.mxu1 %v1759_v56  ;;  %1859 = vmatpush1.msra.mxu0 %v1664_v37  ;;  %v1704_v56 = vld [vmem:[%s4724_s6 + $0x1b0] sm:$0xff] }
 0x153   : > { %2054 = vmatpush2.msra.mxu1 %v1758_v46  ;;  %1860 = vmatprep.subr.mxu0 %v1663_v58  ;;  %v1703_v46 = vld [vmem:[%s4724_s6 + $0x1a8] sm:$0xff] }
 0x154   : > { %2055 = vmatprep.subr.mxu1 %v1757_v23  ;;  %1861 = vmatpush1.msra.mxu0 %v1662_v3  ;;  %v1702_v23 = vld [vmem:[%s4724_s6 + $0x1a0] sm:$0xff] }
 0x155   : > { %2056 = vmatpush2.msra.mxu1 %v1756_v24  ;;  %1862 = vmatprep.subr.mxu0 %v1661_v60  ;;  %v1701_v24 = vld [vmem:[%s4724_s6 + $0x198] sm:$0xff] }
 0x156   : > { %2057 = vmatprep.subr.mxu1 %v1755_v8  ;;  %1863 = vmatpush1.msra.mxu0 %v1660_v17  ;;  %v1700_v8 = vld [vmem:[%s4724_s6 + $0x190] sm:$0xff] }
 0x157   : > { %2058 = vmatpush2.msra.mxu1 %v1754_v25  ;;  %1864 = vmatprep.subr.mxu0 %v1659_v61  ;;  %v1699_v25 = vld [vmem:[%s4724_s6 + $0x188] sm:$0xff]  ;;  %v3722_v61 = vsub.s32 0, %v3087_v5 }
 0x158   : > { %2059 = vmatprep.subr.mxu1 %v1753_v12  ;;  %1865 = vmatpush1.msra.mxu0 %v1658_v62  ;;  %v1698_v12 = vld [vmem:[%s4724_s6 + $0x180] sm:$0xff] }
 0x159   : > { %2060 = vmatpush2.msra.mxu1 %v1752_v26  ;;  %1866 = vmatprep.subr.mxu0 %v1657_v63  ;;  %v1697_v26 = vld [vmem:[%s4724_s6 + $0x178] sm:$0xff]  ;;  %4748 = vst [vmem:[#allocation5_spill] sm:$0xff] %v3722_v61  ;;  %v1338_v63 = vld [vmem:[%s4722_s4] sm:$0x3] }
 0x15a   : > { %2061 = vmatprep.subr.mxu1 %v1751_v42  ;;  %1867 = vmatpush1.msra.mxu0 %v1656_v0  ;;  %v1696_v42 = vld [vmem:[%s4724_s6 + $0x170] sm:$0xff]  ;;  %v3730_v0 = vsub.s32 1, %v3087_v5 }
 0x15b   : > { %2062 = vmatpush2.msra.mxu1 %v1750_v27  ;;  %1868 = vmatprep.subr.mxu0 %v1655_v31  ;;  %v1695_v27 = vld [vmem:[%s4724_s6 + $0x168] sm:$0xff] }
 0x15c   : > { %2063 = vmatprep.subr.mxu1 %v1749_v14  ;;  %1869 = vmatpush1.msra.mxu0 %v1654_v47  ;;  %v1694_v14 = vld [vmem:[%s4724_s6 + $0x160] sm:$0xff]  ;;  %4749 = vst [vmem:[#allocation6_spill] sm:$0xff] %v3730_v0  ;;  %v3735_v47 = vrot.slane %v1338_v63, %v3722_v61 }
 0x15d   : > { %2064 = vmatpush2.msra.mxu1 %v1748_v29  ;;  %1870 = vmatprep.subr.mxu0 %v1653_v2  ;;  %v1693_v29 = vld [vmem:[%s4724_s6 + $0x158] sm:$0xff]  ;;  %v1382_v2 = vld [vmem:[%s4723_s5] sm:$0x3] }
 0x15e   : > { %2065 = vmatprep.subr.mxu1 %v1747_v30  ;;  %1871 = vmatpush1.msra.mxu0 %v1652_v4  ;;  %v1692_v30 = vld [vmem:[%s4724_s6 + $0x150] sm:$0xff] }
 0x15f   : > { %2066 = vmatpush2.msra.mxu1 %v1746_v32  ;;  %1872 = vmatprep.subr.mxu0 %v1651_v7  ;;  %v1691_v32 = vld [vmem:[%s4724_s6 + $0x148] sm:$0xff] }
 0x160   : > { %1873 = vmatpush1.msra.mxu0 %v1650_v9 }
 0x161   : > { %1874 = vmatprep.subr.mxu0 %v1713_v10  ;;  %v3743_v10 = vrot.slane %v1338_v63, %v3730_v0 }
 0x162   : > { %1875 = vmatpush2.msra.mxu0 %v1712_v55  ;;  %v3746_v55 = vrot.slane %v1382_v2, %v3722_v61 }
 0x163   : > { %1876 = vmatprep.subr.mxu0 %v1711_v35 }
 0x164   : > { %1877 = vmatpush2.msra.mxu0 %v1710_v11 }
 0x165   : > { %1878 = vmatprep.subr.mxu0 %v1709_v13 }
 0x166   : > { %1879 = vmatpush2.msra.mxu0 %v1708_v19 }
 0x167   : > { %1880 = vmatprep.subr.mxu0 %v1707_v6  ;;  %v3752_v6 = vrot.slane %v1382_v2, %v3730_v0 }
 0x168   : > { %1881 = vmatpush2.msra.mxu0 %v1706_v20 }
 0x169   : > { %1882 = vmatprep.subr.mxu0 %v1705_v52 }
 0x16a   : > { %1883 = vmatpush2.msra.mxu0 %v1704_v56 }
 0x16b   : > { %1884 = vmatprep.subr.mxu0 %v1703_v46 }
 0x16c   : > { %1885 = vmatpush2.msra.mxu0 %v1702_v23 }
 0x16d   : > { %1886 = vmatprep.subr.mxu0 %v1701_v24 }
 0x16e   : > { %1887 = vmatpush2.msra.mxu0 %v1700_v8 }
 0x16f   : > { %1888 = vmatprep.subr.mxu0 %v1699_v25 }
 0x170   : > { %1889 = vmatpush2.msra.mxu0 %v1698_v12 }
 0x171   : > { %1890 = vmatprep.subr.mxu0 %v1697_v26 }
 0x172   : > { %1891 = vmatpush2.msra.mxu0 %v1696_v42 }
 0x173   : > { %1892 = vmatprep.subr.mxu0 %v1695_v27 }
 0x174   : > { %1893 = vmatpush2.msra.mxu0 %v1694_v14 }
 0x175   : > { %1894 = vmatprep.subr.mxu0 %v1693_v29 }
 0x176   : > { %1895 = vmatpush2.msra.mxu0 %v1692_v30 }
 0x177   : > { %1896 = vmatprep.subr.mxu0 %v1691_v32 }
 0x178   : > { %1897 = vmatpush2.msra.mxu0 %v1690_v33 }
 0x179   : > { %1898 = vmatprep.subr.mxu0 %v1689_v59 }
 0x17a   : > { %1899 = vmatpush2.msra.mxu0 %v1688_v38 }
 0x17b   : > { %1900 = vmatprep.subr.mxu0 %v1687_v39 }
 0x17c   : > { %1901 = vmatpush2.msra.mxu0 %v1686_v18 }
 0x17d   : > { %1902 = vmatprep.subr.mxu0 %v1685_v40 }
 0x17e   : > { %1903 = vmatpush2.msra.mxu0 %v1684_v41 }
 0x17f   : > { %1904 = vmatprep.subr.mxu0 %v1683_v43 }
 0x180   : > { %1905 = vmatpush2.msra.mxu0 %v1682_v1 }
 0x181   : > { %2164 = vmatprep.subr.mxu0 %v1809_v44 }
 0x1b4   : > { %v1243_v48 = vpop.f32.mrf.mxu0 }
 0x1b6   : > { %v1245_v49 = vpop.f32.mrf.mxu0 }
 0x1b8   : > { %v1249_v50 = vpop.f32.mrf.mxu0 }
 0x1ba   : > { %v1251_v51 = vpop.f32.mrf.mxu0 }
 0x1bc   : > { %v1255_v21 = vpop.f32.mrf.mxu0 }
 0x1be   : > { %v1257_v22 = vpop.f32.mrf.mxu0 }
 0x1c0   : > { %v1261_v57 = vpop.f32.mrf.mxu0 }
 0x1c2   : > { %v1263_v37 = vpop.f32.mrf.mxu0 }
 0x1c4   : > { %v3713_v58 = vpop.f32.mrf.mxu0 }
 0x1c6   : > { %v3715_v3 = vpop.f32.mrf.mxu0 }
 0x1c8   : > { %v3717_v60 = vpop.f32.mrf.mxu0 }
 0x1ca   : > { %v3719_v17 = vpop.f32.mrf.mxu0 }
 0x1cc   : > { %v3724_v62 = vpop.f32.mrf.mxu0 }
 0x1ce   : > { %v3732_v31 = vpop.f32.mrf.mxu0 }
 0x1d0   : > { %v1082_v4 = vpop.f32.mrf.mxu1  ;;  %v3740_v7 = vpop.f32.mrf.mxu0 }
 0x1d1   : > { %v1244_v9 = vadd.f32 %v1243_v48, %v1082_v4 }
 0x1d2   : > { %v1084_v35 = vpop.f32.mrf.mxu1  ;;  %v3748_v11 = vpop.f32.mrf.mxu0 }
 0x1d3   : > { %v1350_v13 = vmul.f32 %v3735_v47, %v1244_v9  ;;  %v1246_v19 = vadd.f32 %v1245_v49, %v1084_v35 }
 0x1d4   : > { %v1088_v20 = vpop.f32.mrf.mxu1  ;;  %v3754_v52 = vpop.f32.mrf.mxu0 }
 0x1d5   : > { %v1351_v56 = vmul.f32 %v3743_v10, %v1246_v19  ;;  %v1250_v46 = vadd.f32 %v1249_v50, %v1088_v20  ;;  %v1394_v23 = vadd.f32 %v3746_v55, %v1350_v13 }
 0x1d6   : > { %v1090_v24 = vpop.f32.mrf.mxu1  ;;  %v3758_v8 = vpop.f32.mrf.mxu0 }
 0x1d7   : > { %v1352_v25 = vmul.f32 %v3735_v47, %v1250_v46  ;;  %v1252_v12 = vadd.f32 %v1251_v51, %v1090_v24  ;;  %v1395_v26 = vadd.f32 %v3752_v6, %v1351_v56  ;;  %v3763_v29 = vmax.f32 %v1394_v23, 0.0 }
 0x1d8   : > { %v1094_v42 = vpop.f32.mrf.mxu1  ;;  %v3765_v30 = vpop.f32.mrf.mxu0 }
 0x1d9   : > { %v1353_v27 = vmul.f32 %v3743_v10, %v1252_v12  ;;  %v1256_v14 = vadd.f32 %v1255_v21, %v1094_v42  ;;  %v3767_v33 = vmax.f32 %v1395_v26, 0.0  ;;  %v1396_v59 = vadd.f32 %v3746_v55, %v1352_v25 }
 0x1da   : > { %v1096_v32 = vpop.f32.mrf.mxu1  ;;  %v4728_v49 = vrot.slane %v3763_v29, 1  ;;  %v3781_v50 = vpop.f32.mrf.mxu0 }
 0x1db   : > { %v1354_v38 = vmul.f32 %v3735_v47, %v1256_v14  ;;  %v1258_v39 = vadd.f32 %v1257_v22, %v1096_v32  ;;  %v1397_v18 = vadd.f32 %v3752_v6, %v1353_v27  ;;  %2067 = vmatprep.mubr.f32.mxu1 %v3767_v33  ;;  %v3773_v41 = vmax.f32 %v1396_v59, 0.0 }
 0x1dc   : > { %v1100_v40 = vpop.f32.mrf.mxu1  ;;  %2068 = vmatmul.mubr.f32.vlgmr.msra.gmra.mxu1 %v3763_v29  ;;  %v4729_v9 = vrot.slane %v3767_v33, 1  ;;  %v3803_v46 = vpop.f32.mrf.mxu0 }
 0x1dd   : > { %v1355_v43 = vmul.f32 %v3743_v10, %v1258_v39  ;;  %v1262_v1 = vadd.f32 %v1261_v57, %v1100_v40  ;;  %v3777_v44 = vmax.f32 %v1397_v18, 0.0  ;;  %v1398_v48 = vadd.f32 %v3746_v55, %v1354_v38 }
 0x1de   : > { %v1102_v51 = vpop.f32.mrf.mxu1  ;;  %v1556_v21 = vrot.slane %v3773_v41, 1  ;;  %v3829_v18 = vpop.f32.mrf.mxu0 }
 0x1df   : > { %v1356_v22 = vmul.f32 %v3735_v47, %v1262_v1  ;;  %v1264_v63 = vadd.f32 %v1263_v37, %v1102_v51  ;;  %2073 = vmatprep.mubr.f32.mxu1 %v3777_v44  ;;  %v1399_v57 = vadd.f32 %v3752_v6, %v1355_v43  ;;  %v3787_v2 = vmax.f32 %v1398_v48, 0.0 }
 0x1e0   : > { %v1106_v4 = vpop.f32.mrf.mxu1  ;;  %v1557_v35 = vrot.slane %v3777_v44, 1  ;;  %v3795_v13 = vsel %vm887_vm0, %v4728_v49, %v1556_v21  ;;  %2074 = vmatmul.mubr.f32.gmra.mxu1 %v3773_v41 }
 0x1e1   : > { %v1357_v19 = vmul.f32 %v3743_v10, %v1264_v63  ;;  %v1268_v37 = vadd.f32 %v3713_v58, %v1106_v4  ;;  %v3800_v20 = vmax.f32 %v1399_v57, 0.0  ;;  %v1400_v56 = vadd.f32 %v3746_v55, %v1356_v22 }
 0x1e2   : > { %v1108_v23 = vpop.f32.mrf.mxu1  ;;  %v3809_v24 = vsel %vm887_vm0, %v4729_v9, %v1557_v35  ;;  %v1558_v25 = vrot.slane %v3787_v2, 1 }
 0x1e3   : > { %v1358_v12 = vmul.f32 %v3735_v47, %v1268_v37  ;;  %v1270_v58 = vadd.f32 %v3715_v3, %v1108_v23  ;;  %2079 = vmatprep.mubr.f32.mxu1 %v3800_v20  ;;  %v1401_v26 = vadd.f32 %v3752_v6, %v1357_v19  ;;  %v3816_v42 = vmax.f32 %v1400_v56, 0.0  ;;  %v3852_v19 = vpop.f32.mrf.mxu0 }
 0x1e4   : > { %v1112_v27 = vpop.f32.mrf.mxu1  ;;  %v1559_v14 = vrot.slane %v3800_v20, 1  ;;  %v3821_v32 = vsel %vm887_vm0, %v1556_v21, %v1558_v25  ;;  %2080 = vmatmul.mubr.f32.gmra.mxu1 %v3787_v2 }
 0x1e5   : > { %v1359_v59 = vmul.f32 %v3743_v10, %v1270_v58  ;;  %v1274_v38 = vadd.f32 %v3717_v60, %v1112_v27  ;;  %v3826_v3 = vmax.f32 %v1401_v26, 0.0  ;;  %v1402_v39 = vadd.f32 %v3746_v55, %v1358_v12 }
 0x1e6   : > { %v1114_v40 = vpop.f32.mrf.mxu1  ;;  %v3833_v43 = vsel %vm887_vm0, %v1557_v35, %v1559_v14  ;;  %v1560_v1 = vrot.slane %v3816_v42, 1 }
 0x1e7   : > { %v1360_v48 = vmul.f32 %v3735_v47, %v1274_v38  ;;  %v1276_v51 = vadd.f32 %v3719_v17, %v1114_v40  ;;  %2085 = vmatprep.mubr.f32.mxu1 %v3826_v3  ;;  %v1403_v60 = vadd.f32 %v3752_v6, %v1359_v59  ;;  %v3840_v21 = vmax.f32 %v1402_v39, 0.0  ;;  %v3872_v39 = vpop.f32.mrf.mxu0 }
 0x1e8   : > { %v1118_v22 = vpop.f32.mrf.mxu1  ;;  %v1561_v63 = vrot.slane %v3826_v3, 1  ;;  %v3845_v57 = vsel %vm887_vm0, %v1558_v25, %v1560_v1  ;;  %2086 = vmatmul.mubr.f32.gmra.mxu1 %v3816_v42 }
 0x1e9   : > { %v1361_v4 = vmul.f32 %v3743_v10, %v1276_v51  ;;  %v1280_v35 = vadd.f32 %v3724_v62, %v1118_v22  ;;  %v3850_v17 = vmax.f32 %v1403_v60, 0.0  ;;  %v1562_v56 = vrot.slane %v3840_v21, 1 }
 0x1ea   : > { %v1120_v37 = vpop.f32.mrf.mxu1  ;;  %v1404_v23 = vadd.f32 %v3746_v55, %v1360_v48  ;;  %v3858_v12 = vsel %vm887_vm0, %v1559_v14, %v1561_v63 }
 0x1eb   : > { %v1362_v25 = vmul.f32 %v3735_v47, %v1280_v35  ;;  %v1282_v58 = vadd.f32 %v3732_v31, %v1120_v37  ;;  %2091 = vmatprep.mubr.f32.mxu1 %v3850_v17  ;;  %v1563_v62 = vrot.slane %v3850_v17, 1  ;;  %v1405_v27 = vadd.f32 %v3752_v6, %v1361_v4 }
 0x1ec   : > { %v1124_v26 = vpop.f32.mrf.mxu1  ;;  %v3867_v59 = vsel %vm887_vm0, %v1560_v1, %v1562_v56  ;;  %2092 = vmatmul.mubr.f32.gmra.mxu1 %v3840_v21  ;;  %v3876_v48 = vmax.f32 %v1404_v23, 0.0 }
 0x1ed   : > { %v1363_v38 = vmul.f32 %v3743_v10, %v1282_v58  ;;  %v1286_v14 = vadd.f32 %v3740_v7, %v1124_v26  ;;  %v3874_v40 = vmax.f32 %v1405_v27, 0.0  ;;  %v1406_v22 = vadd.f32 %v3746_v55, %v1362_v25 }
 0x1ee   : > { %v1126_v31 = vpop.f32.mrf.mxu1  ;;  %v3885_v4 = vsel %vm887_vm0, %v1561_v63, %v1563_v62 }
 0x1ef   : > { %v1364_v51 = vmul.f32 %v3735_v47, %v1286_v14  ;;  %v1288_v60 = vadd.f32 %v3748_v11, %v1126_v31  ;;  %v1407_v1 = vadd.f32 %v3752_v6, %v1363_v38  ;;  %2097 = vmatprep.mubr.f32.mxu1 %v3874_v40  ;;  %v1315_v11 = vpop.f32.mrf.mxu0  ;;  %v1565_v25 = vrot.slane %v3874_v40, 1 }
 0x1f0   : > { %v1130_v7 = vpop.f32.mrf.mxu1  ;;  %2098 = vmatmul.mubr.f32.gmra.mxu1 %v3876_v48  ;;  %v3897_v63 = vmax.f32 %v1406_v22, 0.0  ;;  %v1625_v5 = vmul.f32 %v3123_v28, %v3885_v4 }
 0x1f1   : > { %v1365_v35 = vmul.f32 %v3743_v10, %v1288_v60  ;;  %v1292_v37 = vadd.f32 %v3754_v52, %v1130_v7  ;;  %v3890_v23 = vmax.f32 %v1407_v1, 0.0  ;;  %v1408_v26 = vadd.f32 %v3746_v55, %v1364_v51  ;;  %v1317_v7 = vpop.f32.mrf.mxu0 }
 0x1f2   : > { %v1132_v58 = vpop.f32.mrf.mxu1  ;;  %v3902_v31 = vsel %vm887_vm0, %v1563_v62, %v1565_v25  ;;  %v1564_v60 = vrot.slane %v3876_v48, 1 }
 0x1f3   : > { %v1366_v27 = vmul.f32 %v3735_v47, %v1292_v37  ;;  %v1294_v38 = vadd.f32 %v3758_v8, %v1132_v58  ;;  %2103 = vmatprep.mubr.f32.mxu1 %v3890_v23  ;;  %v1409_v52 = vadd.f32 %v3752_v6, %v1365_v35  ;;  %4750 = vst [vmem:[#allocation7_spill] sm:$0xff] %v3902_v31  ;;  %v3910_v37 = vmax.f32 %v1408_v26, 0.0 }
 0x1f4   : > { %v1136_v14 = vpop.f32.mrf.mxu1  ;;  %2104 = vmatmul.mubr.f32.gmra.mxu1 %v3897_v63  ;;  %v3914_v35 = vsel %vm887_vm0, %v1562_v56, %v1564_v60  ;;  %v1567_v62 = vrot.slane %v3890_v23, 1  ;;  %v1566_v56 = vrot.slane %v3897_v63, 1 }
 0x1f5   : > { %v1367_v51 = vmul.f32 %v3743_v10, %v1294_v38  ;;  %v1298_v1 = vadd.f32 %v3765_v30, %v1136_v14  ;;  %v3908_v8 = vmax.f32 %v1409_v52, 0.0  ;;  %4751 = vst [vmem:[#allocation8_spill] sm:$0xff] %v3914_v35  ;;  %v1410_v52 = vadd.f32 %v3746_v55, %v1366_v27 }
 0x1f6   : > { %v1138_v22 = vpop.f32.mrf.mxu1  ;;  %v3924_v26 = vsel %vm887_vm0, %v1565_v25, %v1567_v62  ;;  %v3935_v27 = vsel %vm887_vm0, %v1564_v60, %v1566_v56 }
 0x1f7   : > { %v1368_v58 = vmul.f32 %v3735_v47, %v1298_v1  ;;  %v1300_v38 = vadd.f32 %v3781_v50, %v1138_v22  ;;  %2109 = vmatprep.mubr.f32.mxu1 %v3908_v8  ;;  %v1411_v30 = vadd.f32 %v3752_v6, %v1367_v51  ;;  %4752 = vst [vmem:[#allocation9_spill] sm:$0xff] %v3924_v26  ;;  %v1321_v1 = vpop.f32.mrf.mxu0  ;;  %4753 = vst [vmem:[#allocation10_spill] sm:$0xff] %v3935_v27 }
 0x1f8   : > { %v1142_v14 = vpop.f32.mrf.mxu1  ;;  %2110 = vmatmul.mubr.f32.gmra.mxu1 %v3910_v37 }
 0x1f9   : > { %v1369_v49 = vmul.f32 %v3743_v10, %v1300_v38  ;;  %v1304_v9 = vadd.f32 %v3803_v46, %v1142_v14  ;;  %v3930_v50 = vmax.f32 %v1411_v30, 0.0  ;;  %v1412_v51 = vadd.f32 %v3746_v55, %v1368_v58  ;;  %v1323_v60 = vpop.f32.mrf.mxu0 }
 0x1fa   : > { %v1144_v22 = vpop.f32.mrf.mxu1  ;;  %v3940_v38 = vmax.f32 %v1410_v52, 0.0  ;;  %v1569_v14 = vrot.slane %v3908_v8, 1 }
 0x1fb   : > { %v1370_v25 = vmul.f32 %v3735_v47, %v1304_v9  ;;  %v1306_v0 = vadd.f32 %v3829_v18, %v1144_v22  ;;  %2115 = vmatprep.mubr.f32.mxu1 %v3930_v50  ;;  %v1413_v30 = vadd.f32 %v3752_v6, %v1369_v49  ;;  %v1571_v9 = vrot.slane %v3930_v50, 1 }
 0x1fc   : > { %v1148_v46 = vpop.f32.mrf.mxu1  ;;  %2116 = vmatmul.mubr.f32.gmra.mxu1 %v3940_v38  ;;  %v3950_v22 = vmax.f32 %v1412_v51, 0.0  ;;  %v3960_v54 = vsel %vm887_vm0, %v1567_v62, %v1569_v14  ;;  %v1568_v51 = vrot.slane %v3910_v37, 1 }
 0x1fd   : > { %v1371_v61 = vmul.f32 %v3743_v10, %v1306_v0  ;;  %v1310_v58 = vadd.f32 %v3852_v19, %v1148_v46  ;;  %v3948_v18 = vmax.f32 %v1413_v30, 0.0  ;;  %v1414_v0 = vadd.f32 %v3746_v55, %v1370_v25  ;;  %4754 = vst [vmem:[#allocation11_spill] sm:$0xff] %v3960_v54 }
 0x1fe   : > { %v1150_v16 = vpop.f32.mrf.mxu1  ;;  %v1570_v19 = vrot.slane %v3940_v38, 1  ;;  %v3970_v27 = vsel %vm887_vm0, %v1566_v56, %v1568_v51  ;;  %v3974_v62 = vsel %vm887_vm0, %v1569_v14, %v1571_v9 }
 0x1ff   : > { %v1372_v52 = vmul.f32 %v3735_v47, %v1310_v58  ;;  %v1312_v49 = vadd.f32 %v3872_v39, %v1150_v16  ;;  %v1415_v36 = vadd.f32 %v3752_v6, %v1371_v61  ;;  %2121 = vmatprep.mubr.f32.mxu1 %v3948_v18  ;;  %v1327_v61 = vpop.f32.mrf.mxu0  ;;  %4755 = vst [vmem:[#allocation12_spill] sm:$0xff] %v3970_v27  ;;  %4756 = vst [vmem:[#allocation13_spill] sm:$0xff] %v3974_v62 }
 0x200   : > { %v1154_v46 = vpop.f32.mrf.mxu1  ;;  %2122 = vmatmul.mubr.f32.gmra.mxu1 %v3950_v22 }
 0x201   : > { %v1373_v30 = vmul.f32 %v3743_v10, %v1312_v49  ;;  %v1316_v58 = vadd.f32 %v1315_v11, %v1154_v46  ;;  %v3965_v16 = vmax.f32 %v1415_v36, 0.0  ;;  %v1416_v25 = vadd.f32 %v3746_v55, %v1372_v52 }
 0x202   : > { %v1156_v39 = vpop.f32.mrf.mxu1  ;;  %v3978_v11 = vmax.f32 %v1414_v0, 0.0  ;;  %v3983_v52 = vsel %vm887_vm0, %v1568_v51, %v1570_v19  ;;  %v1573_v0 = vrot.slane %v3948_v18, 1 }
 0x203   : > { %v1374_v54 = vmul.f32 %v3735_v47, %v1316_v58  ;;  %v1318_v49 = vadd.f32 %v1317_v7, %v1156_v39  ;;  %2127 = vmatprep.mubr.f32.mxu1 %v3965_v16  ;;  %v1417_v36 = vadd.f32 %v3752_v6, %v1373_v30  ;;  %4757 = vst [vmem:[#allocation14_spill] sm:$0xff] %v3983_v52  ;;  %v1329_v58 = vpop.f32.mrf.mxu0  ;;  %v3989_v39 = vmax.f32 %v1416_v25, 0.0 }
 0x204   : > { %v1160_v46 = vpop.f32.mrf.mxu1  ;;  %2128 = vmatmul.mubr.f32.gmra.mxu1 %v3978_v11 }
 0x205   : > { %v1375_v56 = vmul.f32 %v3743_v10, %v1318_v49  ;;  %v1322_v27 = vadd.f32 %v1321_v1, %v1160_v46  ;;  %v3987_v14 = vmax.f32 %v1417_v36, 0.0  ;;  %v1418_v49 = vadd.f32 %v3746_v55, %v1374_v54 }
 0x206   : > { %v1162_v7 = vpop.f32.mrf.mxu1  ;;  %v3998_v36 = vsel %vm887_vm0, %v1571_v9, %v1573_v0  ;;  %v1572_v46 = vrot.slane %v3950_v22, 1 }
 0x207   : > { %v1376_v30 = vmul.f32 %v3735_v47, %v1322_v27  ;;  %v1324_v62 = vadd.f32 %v1323_v60, %v1162_v7  ;;  %2133 = vmatprep.mubr.f32.mxu1 %v3987_v14  ;;  %v1419_v51 = vadd.f32 %v3752_v6, %v1375_v56  ;;  %4758 = vst [vmem:[#allocation15_spill] sm:$0xff] %v3998_v36  ;;  %v1333_v60 = vpop.f32.mrf.mxu0  ;;  %v4012_v26 = vmax.f32 %v1418_v49, 0.0 }
 0x208   : > { %v1166_v1 = vpop.f32.mrf.mxu1  ;;  %2134 = vmatmul.mubr.f32.gmra.mxu1 %v3989_v39  ;;  %v4008_v54 = vsel %vm887_vm0, %v1570_v19, %v1572_v46 }
 0x209   : > { %v1377_v25 = vmul.f32 %v3743_v10, %v1324_v62  ;;  %v1328_v52 = vadd.f32 %v1327_v61, %v1166_v1  ;;  %v4003_v27 = vmax.f32 %v1419_v51, 0.0  ;;  %v1420_v56 = vadd.f32 %v3746_v55, %v1376_v30  ;;  %4759 = vst [vmem:[#allocation16_spill] sm:$0xff] %v4008_v54  ;;  %v1335_v30 = vpop.f32.mrf.mxu0 }
 0x20a   : > { %v1168_v7 = vpop.f32.mrf.mxu1  ;;  %v1575_v51 = vrot.slane %v3965_v16, 1 }
 0x20b   : > { %v1378_v9 = vmul.f32 %v3735_v47, %v1328_v52  ;;  %v1330_v36 = vadd.f32 %v1329_v58, %v1168_v7  ;;  %2139 = vmatprep.mubr.f32.mxu1 %v4003_v27  ;;  %v1421_v62 = vadd.f32 %v3752_v6, %v1377_v25  ;;  %v4020_v52 = vmax.f32 %v1420_v56, 0.0 }
 0x20c   : > { %v1172_v61 = vpop.f32.mrf.mxu1  ;;  %2140 = vmatmul.mubr.f32.gmra.mxu1 %v4012_v26  ;;  %v1579_v31 = vrot.slane %v4003_v27, 1  ;;  %v1574_v56 = vrot.slane %v3978_v11, 1 }
 0x20d   : > { %v1379_v1 = vmul.f32 %v3743_v10, %v1330_v36  ;;  %v1334_v35 = vadd.f32 %v1333_v60, %v1172_v61  ;;  %v4018_v54 = vmax.f32 %v1421_v62, 0.0  ;;  %v1422_v25 = vadd.f32 %v3746_v55, %v1378_v9 }
 0x20e   : > { %v1174_v19 = vpop.f32.mrf.mxu1  ;;  %v1578_v36 = vrot.slane %v4012_v26, 1  ;;  %v4030_v60 = vsel %vm887_vm0, %v1573_v0, %v1575_v51  ;;  %v4040_v9 = vsel %vm887_vm0, %v1572_v46, %v1574_v56  ;;  %v1577_v62 = vrot.slane %v3987_v14, 1 }
 0x20f   : > { %v1380_v58 = vmul.f32 %v3735_v47, %v1334_v35  ;;  %v1336_v49 = vadd.f32 %v1335_v30, %v1174_v19  ;;  %v1423_v7 = vadd.f32 %v3752_v6, %v1379_v1  ;;  %2145 = vmatprep.mubr.f32.mxu1 %v4018_v54  ;;  %v1576_v1 = vrot.slane %v3989_v39, 1 }
 0x210   : > { %2146 = vmatmul.mubr.f32.gmra.mxu1 %v4020_v52  ;;  %v4045_v0 = vmax.f32 %v1422_v25, 0.0  ;;  %v4052_v19 = vsel %vm887_vm0, %v1575_v51, %v1577_v62  ;;  %v4060_v46 = vsel %vm887_vm0, %v1577_v62, %v1579_v31  ;;  %v1458_v51 = vrot.slane %v3763_v29, 7 }
 0x211   : > { %v1381_v61 = vmul.f32 %v3743_v10, %v1336_v49  ;;  %v4035_v47 = vmax.f32 %v1423_v7, 0.0  ;;  %v1424_v35 = vadd.f32 %v3746_v55, %v1380_v58  ;;  %v4056_v55 = vsel %vm887_vm0, %v1574_v56, %v1576_v1  ;;  %4761 = vst [vmem:[#allocation18_spill] sm:$0xff] %v4060_v46 }
 0x212   : > { %4760 = vst [vmem:[#allocation17_spill] sm:$0xff] %v4056_v55  ;;  %v4064_v58 = vsel %vm887_vm0, %v1576_v1, %v1578_v36  ;;  %v1581_v7 = vrot.slane %v4018_v54, 1  ;;  %v1580_v25 = vrot.slane %v4020_v52, 1  ;;  %v1582_v62 = vrot.slane %v4045_v0, 1 }
 0x213   : > { %2151 = vmatprep.mubr.f32.mxu1 %v4035_v47  ;;  %v1425_v10 = vadd.f32 %v3752_v6, %v1381_v61  ;;  %v4048_v30 = vmax.f32 %v1424_v35, 0.0  ;;  %4762 = vst [vmem:[#allocation19_spill] sm:$0xff] %v4064_v58  ;;  %v1583_v56 = vrot.slane %v4035_v47, 1  ;;  %v1459_v61 = vrot.slane %v3767_v33, 7 }
 0x214   : > { %2152 = vmatmul.mubr.f32.gmra.mxu1 %v4045_v0  ;;  %v4088_v58 = vsel %vm887_vm0, %v1578_v36, %v1580_v25 }
 0x215   : > { %v4067_v6 = vmax.f32 %v1425_v10, 0.0  ;;  %v4740_v49 = vrot.slane %v4048_v30, 7  ;;  %v4084_v10 = vsel %vm887_vm0, %v1579_v31, %v1581_v7  ;;  %4764 = vst [vmem:[#allocation21_spill] sm:$0xff] %v4088_v58  ;;  %v4092_v35 = vsel %vm887_vm0, %v1581_v7, %v1583_v56 }
 0x216   : > { %4763 = vst [vmem:[#allocation20_spill] sm:$0xff] %v4084_v10  ;;  %4765 = vst [vmem:[#allocation22_spill] sm:$0xff] %v4092_v35  ;;  %v4102_v31 = vsel %vm887_vm0, %v1580_v25, %v1582_v62  ;;  %v1584_v7 = vrot.slane %v4048_v30, 1  ;;  %v1808_v10 = vld [vmem:[%s4724_s6 + $0x4f0] sm:$0xff] }
 0x217   : > { %2157 = vmatprep.mubr.f32.mxu1 %v4067_v6  ;;  %v1520_v1 = vsel %vm838_vm4, %v4740_v49, %v1458_v51  ;;  %v4766_v55 = vrot.slane %v4067_v6, 7  ;;  %v1461_v49 = vrot.slane %v3777_v44, 7  ;;  %v1585_v36 = vrot.slane %v4067_v6, 1 }
 0x218   : > { %2158 = vmatmul.mubr.f32.gmra.mxu1 %v4048_v30  ;;  %v1522_v35 = vmul.f32 %v3160_v53, %v1520_v1  ;;  %v4767_v44 = vrot.slane %v3767_v33, 1  ;;  %v4127_v1 = vsel %vm887_vm0, %v1582_v62, %v1584_v7  ;;  %v1803_v62 = vld [vmem:[%s4724_s6 + $0x4c8] sm:$0xff] }
 0x219   : > { %v1521_v46 = vsel %vm838_vm4, %v4766_v55, %v1459_v61  ;;  %v4113_v55 = vsel %vm887_vm0, %v1583_v56, %v1585_v36  ;;  %v4768_v56 = vrot.slane %v3763_v29, 1  ;;  %v1805_v29 = vld [vmem:[%s4724_s6 + $0x4d8] sm:$0xff] }
 0x21a   : > { %v1523_v58 = vmul.f32 %v3160_v53, %v1521_v46  ;;  %v4119_v25 = vsel %vm887_vm0, %v1585_v36, %v4767_v44  ;;  %v1807_v46 = vld [vmem:[%s4724_s6 + $0x4e8] sm:$0xff]  ;;  %v1460_v53 = vrot.slane %v3773_v41, 7  ;;  %v1806_v36 = vld [vmem:[%s4724_s6 + $0x4e0] sm:$0xff]  ;;  %v1463_v41 = vrot.slane %v3800_v20, 7 }
 0x21b   : > { %v4133_v33 = vsel %vm887_vm0, %v1584_v7, %v4768_v56  ;;  %v1462_v20 = vrot.slane %v3787_v2, 7  ;;  %v1802_v44 = vld [vmem:[%s4724_s6 + $0x4c0] sm:$0xff]  ;;  %v1800_v2 = vld [vmem:[%s4724_s6 + $0x4b0] sm:$0xff]  ;;  %v1464_v56 = vrot.slane %v3816_v42, 7 }
 0x21c   : > { %1906 = vmatprep.mubr.f32.mxu0 %v1523_v58  ;;  %v1519_v58 = vsel %vm838_vm4, %v1459_v61, %v1461_v49  ;;  %v1518_v61 = vsel %vm838_vm4, %v1458_v51, %v1460_v53  ;;  %v1517_v7 = vsel %vm838_vm4, %v1461_v49, %v1463_v41  ;;  %v1801_v51 = vld [vmem:[%s4724_s6 + $0x4b8] sm:$0xff]  ;;  %v1796_v42 = vld [vmem:[%s4724_s6 + $0x490] sm:$0xff] }
 0x21d   : > { %1907 = vmatmul.mubr.f32.vlgmr.msra.gmra.mxu0 %v1522_v35  ;;  %v1804_v35 = vld [vmem:[%s4724_s6 + $0x4d0] sm:$0xff]  ;;  %v1516_v49 = vsel %vm838_vm4, %v1460_v53, %v1462_v20  ;;  %v1797_v53 = vld [vmem:[%s4724_s6 + $0x498] sm:$0xff] }
 0x21e   : > { %2165 = vmatpush1.msra.mxu0 %v1808_v10  ;;  %1912 = vmatprep.mubr.f32.mxu0 %v1519_v58  ;;  %v1467_v10 = vrot.slane %v3850_v17, 7  ;;  %v1466_v17 = vrot.slane %v3840_v21, 7 }
 0x21f   : > { %2166 = vmatprep.subr.mxu0 %v1807_v46  ;;  %v1465_v46 = vrot.slane %v3826_v3, 7  ;;  %v1799_v3 = vld [vmem:[%s4724_s6 + $0x4a8] sm:$0xff] }
 0x220   : > { %2167 = vmatpush1.msra.mxu0 %v1806_v36  ;;  %v1798_v36 = vld [vmem:[%s4724_s6 + $0x4a0] sm:$0xff] }
 0x221   : > { %2168 = vmatprep.subr.mxu0 %v1805_v29  ;;  %1913 = vmatmul.mubr.f32.gmra.mxu0 %v1518_v61  ;;  %v1515_v58 = vsel %vm838_vm4, %v1463_v41, %v1465_v46  ;;  %v1513_v21 = vsel %vm838_vm4, %v1465_v46, %v1467_v10  ;;  %v1514_v41 = vsel %vm838_vm4, %v1462_v20, %v1464_v56  ;;  %v1793_v20 = vld [vmem:[%s4724_s6 + $0x478] sm:$0xff]  ;;  %v1792_v46 = vld [vmem:[%s4724_s6 + $0x470] sm:$0xff] }
 0x222   : > { %2169 = vmatpush1.msra.mxu0 %v1804_v35  ;;  %1918 = vmatprep.mubr.f32.mxu0 %v1517_v7  ;;  %v1531_v29 = vmul.f32 %v3244_v34, %v1513_v21  ;;  %v1795_v35 = vld [vmem:[%s4724_s6 + $0x488] sm:$0xff]  ;;  %v1512_v61 = vsel %vm838_vm4, %v1464_v56, %v1466_v17  ;;  %v1469_v7 = vrot.slane %v3874_v40, 7  ;;  %v1468_v40 = vrot.slane %v3876_v48, 7  ;;  %v1788_v48 = vld [vmem:[%s4724_s6 + $0x450] sm:$0xff]  ;;  %v1786_v21 = vld [vmem:[%s4724_s6 + $0x440] sm:$0xff] }
 0x223   : > { %2170 = vmatprep.subr.mxu0 %v1803_v62  ;;  %v1794_v62 = vld [vmem:[%s4724_s6 + $0x480] sm:$0xff]  ;;  %v1787_v56 = vld [vmem:[%s4724_s6 + $0x448] sm:$0xff] }
 0x224   : > { %2171 = vmatpush1.msra.mxu0 %v1802_v44  ;;  %v1530_v44 = vmul.f32 %v3244_v34, %v1512_v61  ;;  %v1790_v34 = vld [vmem:[%s4724_s6 + $0x460] sm:$0xff]  ;;  %v1781_v61 = vld [vmem:[%s4724_s6 + $0x418] sm:$0xff] }
 0x225   : > { %2172 = vmatprep.subr.mxu0 %v1801_v51  ;;  %1919 = vmatmul.mubr.f32.gmra.mxu0 %v1516_v49  ;;  %v1791_v51 = vld [vmem:[%s4724_s6 + $0x468] sm:$0xff]  ;;  %v1471_v49 = vrot.slane %v3890_v23, 7  ;;  %v1470_v23 = vrot.slane %v3897_v63, 7  ;;  %v1784_v63 = vld [vmem:[%s4724_s6 + $0x430] sm:$0xff] }
 0x226   : > { %2173 = vmatpush1.msra.mxu0 %v1800_v2  ;;  %1924 = vmatprep.mubr.f32.mxu0 %v1515_v58  ;;  %v1511_v2 = vsel %vm838_vm4, %v1467_v10, %v1469_v7  ;;  %v1510_v10 = vsel %vm838_vm4, %v1466_v17, %v1468_v40  ;;  %v1475_v58 = vrot.slane %v3930_v50, 7  ;;  %v1785_v17 = vld [vmem:[%s4724_s6 + $0x438] sm:$0xff]  ;;  %v1474_v50 = vrot.slane %v3940_v38, 7 }
 0x227   : > { %2174 = vmatprep.subr.mxu0 %v1799_v3  ;;  %v1789_v3 = vld [vmem:[%s4724_s6 + $0x458] sm:$0xff] }
 0x228   : > { %2175 = vmatpush1.msra.mxu0 %v1798_v36  ;;  %v1509_v36 = vsel %vm838_vm4, %v1469_v7, %v1471_v49 }
 0x229   : > { %2176 = vmatprep.subr.mxu0 %v1797_v53  ;;  %1925 = vmatmul.mubr.f32.gmra.mxu0 %v1514_v41  ;;  %v1473_v53 = vrot.slane %v3908_v8, 7  ;;  %v1783_v8 = vld [vmem:[%s4724_s6 + $0x428] sm:$0xff]  ;;  %v1472_v41 = vrot.slane %v3910_v37, 7  ;;  %v1780_v37 = vld [vmem:[%s4724_s6 + $0x410] sm:$0xff] }
 0x22a   : > { %2177 = vmatpush1.msra.mxu0 %v1796_v42  ;;  %1930 = vmatprep.mubr.f32.mxu0 %v1531_v29  ;;  %v1508_v42 = vsel %vm838_vm4, %v1468_v40, %v1470_v23  ;;  %v1841_v40 = vld [vmem:[%s4724_s6 + $0x5f8] sm:$0xff] }
 0x22b   : > { %2178 = vmatprep.subr.mxu0 %v1795_v35  ;;  %v1507_v29 = vsel %vm838_vm4, %v1471_v49, %v1473_v53  ;;  %v1782_v35 = vld [vmem:[%s4724_s6 + $0x420] sm:$0xff]  ;;  %v1505_v38 = vsel %vm838_vm4, %v1473_v53, %v1475_v58  ;;  %v1839_v49 = vld [vmem:[%s4724_s6 + $0x5e8] sm:$0xff]  ;;  %v1481_v53 = vrot.slane %v3987_v14, 7 }
 0x22c   : > { %2179 = vmatpush1.msra.mxu0 %v1794_v62  ;;  %v1506_v62 = vsel %vm838_vm4, %v1470_v23, %v1472_v41  ;;  %v1539_v7 = vmul.f32 %v3318_v15, %v1505_v38  ;;  %v1835_v23 = vld [vmem:[%s4724_s6 + $0x5c8] sm:$0xff] }
 0x22d   : > { %2180 = vmatprep.subr.mxu0 %v1793_v20  ;;  %1931 = vmatmul.mubr.f32.gmra.mxu0 %v1530_v44  ;;  %v1779_v20 = vld [vmem:[%s4724_s6 + $0x408] sm:$0xff]  ;;  %v1504_v44 = vsel %vm838_vm4, %v1472_v41, %v1474_v50  ;;  %v1829_v41 = vld [vmem:[%s4724_s6 + $0x598] sm:$0xff] }
 0x22e   : > { %2181 = vmatpush1.msra.mxu0 %v1792_v46  ;;  %1936 = vmatprep.mubr.f32.mxu0 %v1511_v2  ;;  %v1778_v46 = vld [vmem:[%s4724_s6 + $0x400] sm:$0xff]  ;;  %v1538_v2 = vmul.f32 %v3318_v15, %v1504_v44  ;;  %v1831_v14 = vld [vmem:[%s4724_s6 + $0x5a8] sm:$0xff]  ;;  %v1824_v44 = vld [vmem:[%s4724_s6 + $0x570] sm:$0xff] }
 0x22f   : > { %2182 = vmatprep.subr.mxu0 %v1791_v51  ;;  %v1477_v51 = vrot.slane %v3948_v18, 7  ;;  %v1476_v18 = vrot.slane %v3950_v22, 7  ;;  %v1838_v15 = vld [vmem:[%s4724_s6 + $0x5e0] sm:$0xff]  ;;  %v1836_v22 = vld [vmem:[%s4724_s6 + $0x5d0] sm:$0xff]  ;;  %v1827_v38 = vld [vmem:[%s4724_s6 + $0x588] sm:$0xff] }
 0x230   : > { %2183 = vmatpush1.msra.mxu0 %v1790_v34  ;;  %v1840_v34 = vld [vmem:[%s4724_s6 + $0x5f0] sm:$0xff] }
 0x231   : > { %2184 = vmatprep.subr.mxu0 %v1789_v3  ;;  %1937 = vmatmul.mubr.f32.gmra.mxu0 %v1510_v10  ;;  %v1503_v3 = vsel %vm838_vm4, %v1475_v58, %v1477_v51  ;;  %v1837_v10 = vld [vmem:[%s4724_s6 + $0x5d8] sm:$0xff]  ;;  %v1483_v58 = vrot.slane %v4003_v27, 7  ;;  %v1482_v27 = vrot.slane %v4012_v26, 7 }
 0x232   : > { %2185 = vmatpush1.msra.mxu0 %v1788_v48  ;;  %1942 = vmatprep.mubr.f32.mxu0 %v1509_v36  ;;  %v1479_v48 = vrot.slane %v3965_v16, 7  ;;  %v1478_v16 = vrot.slane %v3978_v11, 7  ;;  %v1832_v11 = vld [vmem:[%s4724_s6 + $0x5b0] sm:$0xff] }
 0x233   : > { %2186 = vmatprep.subr.mxu0 %v1787_v56  ;;  %v1502_v56 = vsel %vm838_vm4, %v1474_v50, %v1476_v18  ;;  %v1480_v50 = vrot.slane %v3989_v39, 7  ;;  %v1497_v26 = vsel %vm838_vm4, %v1481_v53, %v1483_v58  ;;  %v1828_v39 = vld [vmem:[%s4724_s6 + $0x590] sm:$0xff] }
 0x234   : > { %2187 = vmatpush1.msra.mxu0 %v1786_v21  ;;  %v1501_v36 = vsel %vm838_vm4, %v1477_v51, %v1479_v48  ;;  %v1834_v21 = vld [vmem:[%s4724_s6 + $0x5c0] sm:$0xff] }
 0x235   : > { %2188 = vmatprep.subr.mxu0 %v1785_v17  ;;  %1943 = vmatmul.mubr.f32.gmra.mxu0 %v1508_v42  ;;  %v1833_v17 = vld [vmem:[%s4724_s6 + $0x5b8] sm:$0xff]  ;;  %v1499_v42 = vsel %vm838_vm4, %v1479_v48, %v1481_v53  ;;  %v1810_v53 = vld [vmem:[%s4724_s6 + $0x500] sm:$0xff] }
 0x236   : > { %2189 = vmatpush1.msra.mxu0 %v1784_v63  ;;  %1948 = vmatprep.mubr.f32.mxu0 %v1507_v29  ;;  %v1500_v63 = vsel %vm838_vm4, %v1476_v18, %v1478_v16  ;;  %v1498_v29 = vsel %vm838_vm4, %v1478_v16, %v1480_v50  ;;  %v1813_v16 = vld [vmem:[%s4724_s6 + $0x518] sm:$0xff] }
 0x237   : > { %2190 = vmatprep.subr.mxu0 %v1783_v8  ;;  %v1830_v8 = vld [vmem:[%s4724_s6 + $0x5a0] sm:$0xff] }
 0x238   : > { %2191 = vmatpush1.msra.mxu0 %v1782_v35  ;;  %v1547_v35 = vmul.f32 %v3397_v45, %v1497_v26  ;;  %v4785_v26 = vld [vmem:[#allocation19_spill] sm:$0xff] }
 0x239   : > { %2192 = vmatprep.subr.mxu0 %v1781_v61  ;;  %1949 = vmatmul.mubr.f32.gmra.mxu0 %v1506_v62  ;;  %v1496_v61 = vsel %vm838_vm4, %v1480_v50, %v1482_v27  ;;  %v1485_v62 = vrot.slane %v4018_v54, 7  ;;  %v1484_v54 = vrot.slane %v4020_v52, 7  ;;  %v1820_v52 = vld [vmem:[%s4724_s6 + $0x550] sm:$0xff]  ;;  %v4783_v50 = vld [vmem:[#allocation3_spill] sm:$0xff] }
 0x23a   : > { %2193 = vmatpush1.msra.mxu0 %v1780_v37  ;;  %1954 = vmatprep.mubr.f32.mxu0 %v1539_v7  ;;  %v1826_v37 = vld [vmem:[%s4724_s6 + $0x580] sm:$0xff]  ;;  %v1825_v7 = vld [vmem:[%s4724_s6 + $0x578] sm:$0xff] }
 0x23b   : > { %2194 = vmatprep.subr.mxu0 %v1779_v20  ;;  %v1546_v20 = vmul.f32 %v3397_v45, %v1496_v61  ;;  %v1495_v51 = vsel %vm838_vm4, %v1483_v58, %v1485_v62  ;;  %v1822_v45 = vld [vmem:[%s4724_s6 + $0x560] sm:$0xff]  ;;  %v1812_v58 = vld [vmem:[%s4724_s6 + $0x510] sm:$0xff] }
 0x23c   : > { %2195 = vmatpush1.msra.mxu0 %v1778_v46  ;;  %v1823_v46 = vld [vmem:[%s4724_s6 + $0x568] sm:$0xff] }
 0x23d   : > { %2196 = vmatprep.subr.mxu0 %v1841_v40  ;;  %1955 = vmatmul.mubr.f32.gmra.mxu0 %v1538_v2  ;;  %v1487_v40 = vrot.slane %v4035_v47, 7  ;;  %v1821_v2 = vld [vmem:[%s4724_s6 + $0x558] sm:$0xff]  ;;  %v1486_v47 = vrot.slane %v4045_v0, 7  ;;  %v1816_v0 = vld [vmem:[%s4724_s6 + $0x530] sm:$0xff] }
 0x23e   : > { %2197 = vmatpush2.msra.mxu0 %v1840_v34  ;;  %1960 = vmatprep.mubr.f32.mxu0 %v1503_v3  ;;  %v1494_v34 = vsel %vm838_vm4, %v1482_v27, %v1484_v54  ;;  %v1818_v3 = vld [vmem:[%s4724_s6 + $0x540] sm:$0xff]  ;;  %v4778_v27 = vld [vmem:[#allocation12_spill] sm:$0xff] }
 0x23f   : > { %2198 = vmatprep.subr.mxu0 %v1839_v49  ;;  %v1819_v49 = vld [vmem:[%s4724_s6 + $0x548] sm:$0xff]  ;;  %v1493_v18 = vsel %vm838_vm4, %v1485_v62, %v1487_v40  ;;  %v1492_v48 = vsel %vm838_vm4, %v1484_v54, %v1486_v47 }
 0x240   : > { %2199 = vmatpush2.msra.mxu0 %v1838_v15  ;;  %v1817_v15 = vld [vmem:[%s4724_s6 + $0x538] sm:$0xff] }
 0x241   : > { %2200 = vmatprep.subr.mxu0 %v1837_v10  ;;  %1961 = vmatmul.mubr.f32.gmra.mxu0 %v1502_v56  ;;  %v1815_v10 = vld [vmem:[%s4724_s6 + $0x528] sm:$0xff] }
 0x242   : > { %2201 = vmatpush2.msra.mxu0 %v1836_v22  ;;  %1966 = vmatprep.mubr.f32.mxu0 %v1501_v36  ;;  %v4769_v22 = vrot.slane %v4067_v6, 7  ;;  %v4770_v6 = vrot.slane %v4048_v30, 7  ;;  %v1624_v30 = vmul.f32 %v3123_v28, %v3867_v59  ;;  %v4780_v59 = vld [vmem:[#allocation15_spill] sm:$0xff] }
 0x243   : > { %2202 = vmatprep.subr.mxu0 %v1835_v23  ;;  %v1814_v23 = vld [vmem:[%s4724_s6 + $0x520] sm:$0xff] }
 0x244   : > { %2203 = vmatpush2.msra.mxu0 %v1834_v21  ;;  %v1491_v56 = vsel %vm838_vm4, %v1487_v40, %v4769_v22  ;;  %v1490_v36 = vsel %vm838_vm4, %v1486_v47, %v4770_v6  ;;  %v1811_v21 = vld [vmem:[%s4724_s6 + $0x508] sm:$0xff] }
 0x245   : > { %2204 = vmatprep.subr.mxu0 %v1833_v17  ;;  %1967 = vmatmul.mubr.f32.gmra.mxu0 %v1500_v63  ;;  %v4772_v17 = vld [vmem:[#allocation8_spill] sm:$0xff] }
 0x246   : > { %2205 = vmatpush2.msra.mxu0 %v1832_v11  ;;  %1972 = vmatprep.mubr.f32.mxu0 %v1499_v42  ;;  %v4777_v11 = vld [vmem:[#allocation2_spill] sm:$0xff]  ;;  %v4781_v63 = vld [vmem:[#allocation16_spill] sm:$0xff] }
 0x247   : > { %2206 = vmatprep.subr.mxu0 %v1831_v14  ;;  %v4782_v14 = vld [vmem:[#allocation18_spill] sm:$0xff] }
 0x248   : > { %2207 = vmatpush2.msra.mxu0 %v1830_v8  ;;  %v1641_v42 = vmul.f32 %v4783_v50, %v4782_v14  ;;  %v4784_v8 = vld [vmem:[#allocation17_spill] sm:$0xff] }
 0x249   : > { %2208 = vmatprep.subr.mxu0 %v1829_v41  ;;  %1973 = vmatmul.mubr.f32.gmra.mxu0 %v1498_v29  ;;  %v1640_v41 = vmul.f32 %v4783_v50, %v4785_v26  ;;  %v4787_v29 = vld [vmem:[#allocation21_spill] sm:$0xff] }
 0x24a   : > { %2209 = vmatpush2.msra.mxu0 %v1828_v39  ;;  %1978 = vmatprep.mubr.f32.mxu0 %v1547_v35  ;;  %v4786_v39 = vld [vmem:[#allocation20_spill] sm:$0xff]  ;;  %v4788_v35 = vld [vmem:[#allocation22_spill] sm:$0xff]  ;;  %v4791_v14 = vld [vmem:[#allocation5_spill] sm:$0xff] }
 0x24b   : > { %2210 = vmatprep.subr.mxu0 %v1827_v38 }
 0x24c   : > { %2211 = vmatpush2.msra.mxu0 %v1826_v37 }
 0x24d   : > { %2212 = vmatprep.subr.mxu0 %v1825_v7  ;;  %1979 = vmatmul.mubr.f32.gmra.mxu0 %v1546_v20 }
 0x24e   : > { %2213 = vmatpush2.msra.mxu0 %v1824_v44  ;;  %1984 = vmatprep.mubr.f32.mxu0 %v1495_v51 }
 0x24f   : > { %2214 = vmatprep.subr.mxu0 %v1823_v46 }
 0x250   : > { %2215 = vmatpush2.msra.mxu0 %v1822_v45 }
 0x251   : > { %2216 = vmatprep.subr.mxu0 %v1821_v2  ;;  %1985 = vmatmul.mubr.f32.gmra.mxu0 %v1494_v34 }
 0x252   : > { %2217 = vmatpush2.msra.mxu0 %v1820_v52  ;;  %1990 = vmatprep.mubr.f32.mxu0 %v1493_v18 }
 0x253   : > { %2218 = vmatprep.subr.mxu0 %v1819_v49 }
 0x254   : > { %2219 = vmatpush2.msra.mxu0 %v1818_v3 }
 0x255   : > { %2220 = vmatprep.subr.mxu0 %v1817_v15  ;;  %1991 = vmatmul.mubr.f32.gmra.mxu0 %v1492_v48 }
 0x256   : > { %2221 = vmatpush2.msra.mxu0 %v1816_v0  ;;  %1996 = vmatprep.mubr.f32.mxu0 %v1491_v56 }
 0x257   : > { %2222 = vmatprep.subr.mxu0 %v1815_v10 }
 0x258   : > { %2223 = vmatpush2.msra.mxu0 %v1814_v23 }
 0x259   : > { %2224 = vmatprep.subr.mxu0 %v1813_v16  ;;  %1997 = vmatmul.mubr.f32.gmra.mxu0 %v1490_v36 }
 0x25a   : > { %2225 = vmatpush2.msra.mxu0 %v1812_v58  ;;  %2228 = vmatprep.mubr.f32.mxu0 %v3809_v24  ;;  %v4771_v24 = vld [vmem:[#allocation7_spill] sm:$0xff] }
 0x25b   : > { %2226 = vmatprep.subr.mxu0 %v1811_v21 }
 0x25c   : > { %2227 = vmatpush2.msra.mxu0 %v1810_v53 }
 0x25d   : > { %2229 = vmatmul.mubr.f32.vlgmr.msra.gmra.mxu0 %v3795_v13  ;;  %v4773_v13 = vld [vmem:[#allocation9_spill] sm:$0xff] }
 0x25e   : > { %2234 = vmatprep.mubr.f32.mxu0 %v3833_v43  ;;  %v4774_v43 = vld [vmem:[#allocation10_spill] sm:$0xff] }
 0x261   : > { %2235 = vmatmul.mubr.f32.gmra.mxu0 %v3821_v32  ;;  %v4775_v32 = vld [vmem:[#allocation11_spill] sm:$0xff] }
 0x262   : > { %2240 = vmatprep.mubr.f32.mxu0 %v3858_v12  ;;  %v4776_v12 = vld [vmem:[#allocation13_spill] sm:$0xff] }
 0x263   : > { %v1633_v4 = vmul.f32 %v4777_v11, %v4776_v12 }
 0x265   : > { %2241 = vmatmul.mubr.f32.gmra.mxu0 %v3845_v57  ;;  %v4779_v57 = vld [vmem:[#allocation14_spill] sm:$0xff] }
 0x266   : > { %2246 = vmatprep.mubr.f32.mxu0 %v1625_v5  ;;  %v1632_v28 = vmul.f32 %v4777_v11, %v4779_v57 }
 0x269   : > { %2247 = vmatmul.mubr.f32.gmra.mxu0 %v1624_v30 }
 0x26a   : > { %2252 = vmatprep.mubr.f32.mxu0 %v4771_v24 }
 0x26d   : > { %2253 = vmatmul.mubr.f32.gmra.mxu0 %v4772_v17 }
 0x26e   : > { %2258 = vmatprep.mubr.f32.mxu0 %v4773_v13 }
 0x271   : > { %2259 = vmatmul.mubr.f32.gmra.mxu0 %v4774_v43 }
 0x272   : > { %2264 = vmatprep.mubr.f32.mxu0 %v4775_v32 }
 0x275   : > { %2265 = vmatmul.mubr.f32.gmra.mxu0 %v4778_v27  ;;  %v2325_v27 = vld [vmem:[%s4725_s7] sm:$0x3] }
 0x276   : > { %2270 = vmatprep.mubr.f32.mxu0 %v1633_v4  ;;  %v4541_v50 = vrot.slane %v2325_v27, %v4791_v14 }
 0x279   : > { %2271 = vmatmul.mubr.f32.gmra.mxu0 %v1632_v28  ;;  %v2369_v28 = vld [vmem:[%s4726_s8] sm:$0x3] }
 0x27a   : > { %2276 = vmatprep.mubr.f32.mxu0 %v4780_v59 }
 0x27d   : > { %2277 = vmatmul.mubr.f32.gmra.mxu0 %v4781_v63 }
 0x27e   : > { %2282 = vmatprep.mubr.f32.mxu0 %v4030_v60  ;;  %v4789_v60 = vld [vmem:[#allocation4_spill] sm:$0xff] }
 0x281   : > { %2283 = vmatmul.mubr.f32.gmra.mxu0 %v4040_v9  ;;  %v1649_v9 = vmul.f32 %v4789_v60, %v4119_v25 }
 0x282   : > { %2288 = vmatprep.mubr.f32.mxu0 %v4052_v19  ;;  %v1648_v19 = vmul.f32 %v4789_v60, %v4133_v33 }
 0x285   : > { %2289 = vmatmul.mubr.f32.gmra.mxu0 %v4784_v8 }
 0x286   : > { %2294 = vmatprep.mubr.f32.mxu0 %v1641_v42 }
 0x289   : > { %2295 = vmatmul.mubr.f32.gmra.mxu0 %v1640_v41  ;;  %v4544_v41 = vrot.slane %v2369_v28, %v4791_v14 }
 0x28a   : > { %2300 = vmatprep.mubr.f32.mxu0 %v4786_v39  ;;  %v4792_v39 = vld [vmem:[#allocation6_spill] sm:$0xff] }
 0x28d   : > { %2301 = vmatmul.mubr.f32.gmra.mxu0 %v4787_v29  ;;  %v4547_v29 = vrot.slane %v2325_v27, %v4792_v39 }
 0x28e   : > { %2306 = vmatprep.mubr.f32.mxu0 %v4788_v35 }
 0x291   : > { %2307 = vmatmul.mubr.f32.gmra.mxu0 %v4102_v31 }
 0x292   : > { %2312 = vmatprep.mubr.f32.mxu0 %v4113_v55 }
 0x295   : > { %2313 = vmatmul.mubr.f32.gmra.mxu0 %v4127_v1 }
 0x296   : > { %2318 = vmatprep.mubr.f32.mxu0 %v1649_v9 }
 0x299   : > { %2319 = vmatmul.mubr.f32.gmra.mxu0 %v1648_v19 }
 0x29c   : > { %v2069_v38 = vpop.f32.mrf.mxu1 }
 0x29e   : > { %v2071_v62 = vpop.f32.mrf.mxu1 }
 0x2a0   : > { %v2075_v44 = vpop.f32.mrf.mxu1 }
 0x2a2   : > { %v2077_v46 = vpop.f32.mrf.mxu1 }
 0x2a4   : > { %v2081_v54 = vpop.f32.mrf.mxu1 }
 0x2a6   : > { %v4466_v45 = vpop.f32.mrf.mxu1 }
 0x2a8   : > { %v4472_v52 = vpop.f32.mrf.mxu1 }
 0x2aa   : > { %v4478_v47 = vpop.f32.mrf.mxu1 }
 0x2ac   : > { %v4484_v15 = vpop.f32.mrf.mxu1 }
 0x2ae   : > { %v4490_v10 = vpop.f32.mrf.mxu1 }
 0x2b0   : > { %v4496_v23 = vpop.f32.mrf.mxu1 }
 0x2b2   : > { %v4502_v6 = vpop.f32.mrf.mxu1 }
 0x2b4   : > { %v4508_v53 = vpop.f32.mrf.mxu1 }
 0x2b6   : > { %v4514_v24 = vpop.f32.mrf.mxu1 }
 0x2b8   : > { %v4520_v43 = vpop.f32.mrf.mxu1 }
 0x2ba   : > { %v4526_v11 = vpop.f32.mrf.mxu1 }
 0x2bc   : > { %v4538_v59 = vpop.f32.mrf.mxu1 }
 0x2be   : > { %v4549_v60 = vpop.f32.mrf.mxu1 }
 0x2dd   : > { %v1908_v61 = vpop.f32.mrf.mxu0 }
 0x2de   : > { %v2070_v63 = vadd.f32 %v2069_v38, %v1908_v61  ;;  %v4554_v61 = vrot.slane %v2369_v28, %v4792_v39 }
 0x2df   : > { %v1910_v37 = vpop.f32.mrf.mxu0 }
 0x2e0   : > { %v2072_v8 = vadd.f32 %v2071_v62, %v1910_v37 }
 0x2e1   : > { %v1914_v7 = vpop.f32.mrf.mxu0 }
 0x2e2   : > { %v2076_v9 = vadd.f32 %v2075_v44, %v1914_v7  ;;  %v4564_v44 = vpop.f32.mrf.mxu1 }
 0x2e3   : > { %v1916_v20 = vpop.f32.mrf.mxu0 }
 0x2e4   : > { %v2078_v37 = vadd.f32 %v2077_v46, %v1916_v20 }
 0x2e5   : > { %v4454_v31 = vpop.f32.mrf.mxu0 }
 0x2e6   : > { %v2082_v27 = vadd.f32 %v2081_v54, %v4454_v31 }
 0x2e7   : > { %v4456_v55 = vpop.f32.mrf.mxu0 }
 0x2e9   : > { %v4458_v25 = vpop.f32.mrf.mxu0 }
 0x2eb   : > { %v4460_v1 = vpop.f32.mrf.mxu0 }
 0x2ed   : > { %v4462_v51 = vpop.f32.mrf.mxu0 }
 0x2ef   : > { %v4464_v33 = vpop.f32.mrf.mxu0 }
 0x2f1   : > { %v4468_v40 = vpop.f32.mrf.mxu0 }
 0x2f3   : > { %v4470_v2 = vpop.f32.mrf.mxu0 }
 0x2f5   : > { %v4474_v34 = vpop.f32.mrf.mxu0 }
 0x2f7   : > { %v4476_v49 = vpop.f32.mrf.mxu0 }
 0x2f9   : > { %v4480_v18 = vpop.f32.mrf.mxu0 }
 0x2fb   : > { %v4482_v3 = vpop.f32.mrf.mxu0 }
 0x2fd   : > { %v4486_v0 = vpop.f32.mrf.mxu0 }
 0x2ff   : > { %v4488_v48 = vpop.f32.mrf.mxu0 }
 0x301   : > { %v4492_v22 = vpop.f32.mrf.mxu0 }
 0x303   : > { %v4494_v56 = vpop.f32.mrf.mxu0 }
 0x305   : > { %v4498_v16 = vpop.f32.mrf.mxu0 }
 0x307   : > { %v4500_v58 = vpop.f32.mrf.mxu0 }
 0x309   : > { %v4504_v36 = vpop.f32.mrf.mxu0 }
 0x30b   : > { %v4506_v21 = vpop.f32.mrf.mxu0 }
 0x30d   : > { %v4510_v5 = vpop.f32.mrf.mxu0 }
 0x30f   : > { %v4512_v30 = vpop.f32.mrf.mxu0 }
 0x311   : > { %v4516_v17 = vpop.f32.mrf.mxu0 }
 0x313   : > { %v4518_v13 = vpop.f32.mrf.mxu0 }
 0x315   : > { %v4522_v32 = vpop.f32.mrf.mxu0 }
 0x317   : > { %v4524_v12 = vpop.f32.mrf.mxu0 }
 0x319   : > { %v4528_v4 = vpop.f32.mrf.mxu0 }
 0x31b   : > { %v4533_v57 = vpop.f32.mrf.mxu0 }
 0x31c   : > { %4790 = vst [vmem:[#allocation7_spill] sm:$0xff] %v4533_v57 }
 0x31d   : > { %v2230_v42 = vpop.f32.mrf.mxu0 }
 0x31e   : > { %v2231_v26 = vadd.f32 %v2230_v42, %v2070_v63 }
 0x31f   : > { %v2232_v35 = vpop.f32.mrf.mxu0 }
 0x320   : > { %v2337_v19 = vmul.f32 %v4541_v50, %v2231_v26  ;;  %v2233_v38 = vadd.f32 %v2232_v35, %v2072_v8  ;;  %v2088_v35 = vadd.f32 %v4472_v52, %v4458_v25 }
 0x321   : > { %v2236_v57 = vpop.f32.mrf.mxu0 }
 0x322   : > { %v2381_v62 = vadd.f32 %v4544_v41, %v2337_v19  ;;  %v2338_v63 = vmul.f32 %v4547_v29, %v2233_v38  ;;  %v2237_v14 = vadd.f32 %v2236_v57, %v2076_v9  ;;  %v2084_v57 = vadd.f32 %v4466_v45, %v4456_v55  ;;  %v4575_v19 = vpop.f32.mrf.mxu1 }
 0x323   : > { %v2238_v7 = vpop.f32.mrf.mxu0 }
 0x324   : > { %v2413_v28 = vmax.f32 %v2381_v62, 0.0  ;;  %v2382_v20 = vadd.f32 %v4554_v61, %v2338_v63  ;;  %v2339_v46 = vmul.f32 %v4541_v50, %v2237_v14  ;;  %v2239_v42 = vadd.f32 %v2238_v7, %v2078_v37 }
 0x325   : > { %v2242_v31 = vpop.f32.mrf.mxu0  ;;  %v2090_v62 = vadd.f32 %v4478_v47, %v4460_v1  ;;  %v2094_v7 = vadd.f32 %v4484_v15, %v4462_v51 }
 0x326   : > { %2445 = vst [vmem:[%s4562_s15] sm:$0xff] %v2413_v28  ;;  %v2414_v54 = vmax.f32 %v2382_v20, 0.0  ;;  %v2383_v8 = vadd.f32 %v4544_v41, %v2339_v46  ;;  %v2340_v26 = vmul.f32 %v4547_v29, %v2239_v42  ;;  %v2243_v39 = vadd.f32 %v2242_v31, %v2082_v27  ;;  %v4587_v20 = vpop.f32.mrf.mxu1 }
 0x327   : > { %v2244_v9 = vpop.f32.mrf.mxu0 }
 0x328   : > { %2446 = vst [vmem:[%s4562_s15 + $0x8] sm:$0xff] %v2414_v54  ;;  %v2415_v38 = vmax.f32 %v2383_v8, 0.0  ;;  %v2384_v55 = vadd.f32 %v4554_v61, %v2340_v26  ;;  %v2341_v45 = vmul.f32 %v4541_v50, %v2243_v39  ;;  %v2245_v37 = vadd.f32 %v2244_v9, %v2084_v57 }
 0x329   : > { %v2248_v63 = vpop.f32.mrf.mxu0  ;;  %v2096_v57 = vadd.f32 %v4490_v10, %v4464_v33  ;;  %v2100_v26 = vadd.f32 %v4496_v23, %v4468_v40 }
 0x32a   : > { %2447 = vst [vmem:[%s4562_s15 + $0x10] sm:$0xff] %v2415_v38  ;;  %v2416_v14 = vmax.f32 %v2384_v55, 0.0  ;;  %v2385_v25 = vadd.f32 %v4544_v41, %v2341_v45  ;;  %v2342_v52 = vmul.f32 %v4547_v29, %v2245_v37  ;;  %v2249_v27 = vadd.f32 %v2248_v63, %v2088_v35  ;;  %v4599_v35 = vpop.f32.mrf.mxu1 }
 0x32b   : > { %v2250_v28 = vpop.f32.mrf.mxu0  ;;  %v2102_v55 = vadd.f32 %v4502_v6, %v4470_v2  ;;  %v2106_v63 = vadd.f32 %v4508_v53, %v4474_v34 }
 0x32c   : > { %2448 = vst [vmem:[%s4562_s15 + $0x18] sm:$0xff] %v2416_v14  ;;  %v2417_v46 = vmax.f32 %v2385_v25, 0.0  ;;  %v2386_v1 = vadd.f32 %v4554_v61, %v2342_v52  ;;  %v2343_v47 = vmul.f32 %v4541_v50, %v2249_v27  ;;  %v2251_v42 = vadd.f32 %v2250_v28, %v2090_v62  ;;  %v4611_v25 = vpop.f32.mrf.mxu1 }
 0x32d   : > { %v2254_v31 = vpop.f32.mrf.mxu0 }
 0x32e   : > { %2449 = vst [vmem:[%s4562_s15 + $0x20] sm:$0xff] %v2417_v46  ;;  %v2418_v54 = vmax.f32 %v2386_v1, 0.0  ;;  %v2387_v51 = vadd.f32 %v4544_v41, %v2343_v47  ;;  %v2344_v15 = vmul.f32 %v4547_v29, %v2251_v42  ;;  %v2255_v8 = vadd.f32 %v2254_v31, %v2094_v7 }
 0x32f   : > { %v2256_v39 = vpop.f32.mrf.mxu0  ;;  %v2108_v7 = vadd.f32 %v4514_v24, %v4476_v49  ;;  %v2112_v47 = vadd.f32 %v4520_v43, %v4480_v18 }
 0x330   : > { %2450 = vst [vmem:[%s4562_s15 + $0x28] sm:$0xff] %v2418_v54  ;;  %v2419_v9 = vmax.f32 %v2387_v51, 0.0  ;;  %v2388_v33 = vadd.f32 %v4554_v61, %v2344_v15  ;;  %v2345_v10 = vmul.f32 %v4541_v50, %v2255_v8  ;;  %v2257_v38 = vadd.f32 %v2256_v39, %v2096_v57  ;;  %v4623_v57 = vpop.f32.mrf.mxu1 }
 0x331   : > { %v2260_v45 = vpop.f32.mrf.mxu0  ;;  %v2114_v51 = vadd.f32 %v4526_v11, %v4482_v3  ;;  %v2118_v39 = vadd.f32 %v4538_v59, %v4486_v0 }
 0x332   : > { %2451 = vst [vmem:[%s4562_s15 + $0x30] sm:$0xff] %v2419_v9  ;;  %v2420_v37 = vmax.f32 %v2388_v33, 0.0  ;;  %v2389_v40 = vadd.f32 %v4544_v41, %v2345_v10  ;;  %v2346_v23 = vmul.f32 %v4547_v29, %v2257_v38  ;;  %v2261_v62 = vadd.f32 %v2260_v45, %v2100_v26  ;;  %v2141_v33 = vpop.f32.mrf.mxu1 }
 0x333   : > { %v2262_v14 = vpop.f32.mrf.mxu0 }
 0x334   : > { %2452 = vst [vmem:[%s4562_s15 + $0x38] sm:$0xff] %v2420_v37  ;;  %v2421_v52 = vmax.f32 %v2389_v40, 0.0  ;;  %v2390_v2 = vadd.f32 %v4554_v61, %v2346_v23  ;;  %v2347_v6 = vmul.f32 %v4541_v50, %v2261_v62  ;;  %v2263_v27 = vadd.f32 %v2262_v14, %v2102_v55 }
 0x335   : > { %v2266_v28 = vpop.f32.mrf.mxu0  ;;  %v2120_v55 = vadd.f32 %v4549_v60, %v4488_v48  ;;  %v2124_v23 = vadd.f32 %v4564_v44, %v4492_v22 }
 0x336   : > { %2453 = vst [vmem:[%s4562_s15 + $0x40] sm:$0xff] %v2421_v52  ;;  %v2422_v46 = vmax.f32 %v2390_v2, 0.0  ;;  %v2391_v34 = vadd.f32 %v4544_v41, %v2347_v6  ;;  %v2348_v53 = vmul.f32 %v4547_v29, %v2263_v27  ;;  %v2267_v1 = vadd.f32 %v2266_v28, %v2106_v63  ;;  %v2143_v63 = vpop.f32.mrf.mxu1 }
 0x337   : > { %v2268_v42 = vpop.f32.mrf.mxu0  ;;  %v2126_v2 = vadd.f32 %v4575_v19, %v4494_v56  ;;  %v2130_v28 = vadd.f32 %v4587_v20, %v4498_v16 }
 0x338   : > { %2454 = vst [vmem:[%s4562_s15 + $0x48] sm:$0xff] %v2422_v46  ;;  %v2423_v31 = vmax.f32 %v2391_v34, 0.0  ;;  %v2392_v49 = vadd.f32 %v4554_v61, %v2348_v53  ;;  %v2349_v24 = vmul.f32 %v4541_v50, %v2267_v1  ;;  %v2269_v54 = vadd.f32 %v2268_v42, %v2108_v7  ;;  %v2147_v34 = vpop.f32.mrf.mxu1 }
 0x339   : > { %v2272_v15 = vpop.f32.mrf.mxu0 }
 0x33a   : > { %2455 = vst [vmem:[%s4562_s15 + $0x50] sm:$0xff] %v2423_v31  ;;  %v2424_v8 = vmax.f32 %v2392_v49, 0.0  ;;  %v2393_v18 = vadd.f32 %v4544_v41, %v2349_v24  ;;  %v2350_v43 = vmul.f32 %v4547_v29, %v2269_v54  ;;  %v2273_v26 = vadd.f32 %v2272_v15, %v2112_v47 }
 0x33b   : > { %v2274_v9 = vpop.f32.mrf.mxu0  ;;  %v2132_v47 = vadd.f32 %v4599_v35, %v4500_v58  ;;  %v2136_v24 = vadd.f32 %v4611_v25, %v4504_v36 }
 0x33c   : > { %2456 = vst [vmem:[%s4562_s15 + $0x58] sm:$0xff] %v2424_v8  ;;  %v2425_v10 = vmax.f32 %v2393_v18, 0.0  ;;  %v2394_v38 = vadd.f32 %v4554_v61, %v2350_v43  ;;  %v2351_v3 = vmul.f32 %v4541_v50, %v2273_v26  ;;  %v2275_v11 = vadd.f32 %v2274_v9, %v2114_v51  ;;  %v2149_v51 = vpop.f32.mrf.mxu1 }
 0x33d   : > { %v2278_v45 = vpop.f32.mrf.mxu0  ;;  %v2138_v18 = vadd.f32 %v4623_v57, %v4506_v21  ;;  %v2142_v9 = vadd.f32 %v2141_v33, %v4510_v5 }
 0x33e   : > { %2457 = vst [vmem:[%s4562_s15 + $0x60] sm:$0xff] %v2425_v10  ;;  %v2426_v37 = vmax.f32 %v2394_v38, 0.0  ;;  %v2395_v40 = vadd.f32 %v4544_v41, %v2351_v3  ;;  %v2352_v0 = vmul.f32 %v4547_v29, %v2275_v11  ;;  %v2279_v59 = vadd.f32 %v2278_v45, %v2118_v39  ;;  %v2153_v38 = vpop.f32.mrf.mxu1 }
 0x33f   : > { %v2280_v62 = vpop.f32.mrf.mxu0 }
 0x340   : > { %2458 = vst [vmem:[%s4562_s15 + $0x68] sm:$0xff] %v2426_v37  ;;  %v2427_v14 = vmax.f32 %v2395_v40, 0.0  ;;  %v2396_v52 = vadd.f32 %v4554_v61, %v2352_v0  ;;  %v2353_v48 = vmul.f32 %v4541_v50, %v2279_v59  ;;  %v2281_v60 = vadd.f32 %v2280_v62, %v2120_v55 }
 0x341   : > { %v2284_v6 = vpop.f32.mrf.mxu0  ;;  %v2144_v55 = vadd.f32 %v2143_v63, %v4512_v30  ;;  %v2148_v0 = vadd.f32 %v2147_v34, %v4516_v17 }
 0x342   : > { %2459 = vst [vmem:[%s4562_s15 + $0x70] sm:$0xff] %v2427_v14  ;;  %v2428_v27 = vmax.f32 %v2396_v52, 0.0  ;;  %v2397_v7 = vadd.f32 %v4544_v41, %v2353_v48  ;;  %v2354_v22 = vmul.f32 %v4547_v29, %v2281_v60  ;;  %v2285_v44 = vadd.f32 %v2284_v6, %v2124_v23  ;;  %v2155_v23 = vpop.f32.mrf.mxu1 }
 0x343   : > { %v2286_v46 = vpop.f32.mrf.mxu0  ;;  %v2150_v52 = vadd.f32 %v2149_v51, %v4518_v13  ;;  %v2156_v34 = vadd.f32 %v2155_v23, %v4524_v12 }
 0x344   : > { %2460 = vst [vmem:[%s4562_s15 + $0x78] sm:$0xff] %v2428_v27  ;;  %v2429_v53 = vmax.f32 %v2397_v7, 0.0  ;;  %v2398_v1 = vadd.f32 %v4554_v61, %v2354_v22  ;;  %v2355_v56 = vmul.f32 %v4541_v50, %v2285_v44  ;;  %v2287_v19 = vadd.f32 %v2286_v46, %v2126_v2  ;;  %v2159_v22 = vpop.f32.mrf.mxu1 }
 0x345   : > { %v2290_v42 = vpop.f32.mrf.mxu0  ;;  %v2154_v27 = vadd.f32 %v2153_v38, %v4522_v32 }
 0x346   : > { %2461 = vst [vmem:[%s4562_s15 + $0x80] sm:$0xff] %v2429_v53  ;;  %v2430_v31 = vmax.f32 %v2398_v1, 0.0  ;;  %v2399_v49 = vadd.f32 %v4544_v41, %v2355_v56  ;;  %v2356_v16 = vmul.f32 %v4547_v29, %v2287_v19  ;;  %v2291_v20 = vadd.f32 %v2290_v42, %v2130_v28 }
 0x347   : > { %v2292_v54 = vpop.f32.mrf.mxu0 }
 0x348   : > { %2462 = vst [vmem:[%s4562_s15 + $0x88] sm:$0xff] %v2430_v31  ;;  %v2431_v15 = vmax.f32 %v2399_v49, 0.0  ;;  %v2400_v8 = vadd.f32 %v4554_v61, %v2356_v16  ;;  %v2357_v58 = vmul.f32 %v4541_v50, %v2291_v20  ;;  %v2293_v35 = vadd.f32 %v2292_v54, %v2132_v47  ;;  %v2161_v31 = vpop.f32.mrf.mxu1 }
 0x349   : > { %v2296_v43 = vpop.f32.mrf.mxu0  ;;  %v2160_v47 = vadd.f32 %v2159_v22, %v4528_v4 }
 0x34a   : > { %2463 = vst [vmem:[%s4562_s15 + $0x90] sm:$0xff] %v2431_v15  ;;  %v2432_v26 = vmax.f32 %v2400_v8, 0.0  ;;  %v2401_v39 = vadd.f32 %v4544_v41, %v2357_v58  ;;  %v2358_v36 = vmul.f32 %v4547_v29, %v2293_v35  ;;  %v2297_v25 = vadd.f32 %v2296_v43, %v2136_v24  ;;  %v4793_v24 = vld [vmem:[#allocation7_spill] sm:$0xff] }
 0x34b   : > { %v2298_v10 = vpop.f32.mrf.mxu0  ;;  %v2162_v54 = vadd.f32 %v2161_v31, %v4793_v24 }
 0x34c   : > { %2464 = vst [vmem:[%s4562_s15 + $0x98] sm:$0xff] %v2432_v26  ;;  %v2433_v3 = vmax.f32 %v2401_v39, 0.0  ;;  %v2402_v11 = vadd.f32 %v4554_v61, %v2358_v36  ;;  %v2359_v21 = vmul.f32 %v4541_v50, %v2297_v25  ;;  %v2299_v57 = vadd.f32 %v2298_v10, %v2138_v18 }
 0x34d   : > { %v2302_v45 = vpop.f32.mrf.mxu0 }
 0x34e   : > { %2465 = vst [vmem:[%s4562_s15 + $0xa0] sm:$0xff] %v2433_v3  ;;  %v2434_v37 = vmax.f32 %v2402_v11, 0.0  ;;  %v2403_v40 = vadd.f32 %v4544_v41, %v2359_v21  ;;  %v2360_v5 = vmul.f32 %v4547_v29, %v2299_v57  ;;  %v2303_v33 = vadd.f32 %v2302_v45, %v2142_v9 }
 0x34f   : > { %v2304_v59 = vpop.f32.mrf.mxu0 }
 0x350   : > { %2466 = vst [vmem:[%s4562_s15 + $0xa8] sm:$0xff] %v2434_v37  ;;  %v2435_v62 = vmax.f32 %v2403_v40, 0.0  ;;  %v2404_v14 = vadd.f32 %v4554_v61, %v2360_v5  ;;  %v2361_v30 = vmul.f32 %v4541_v50, %v2303_v33  ;;  %v2305_v63 = vadd.f32 %v2304_v59, %v2144_v55 }
 0x351   : > { %v2308_v48 = vpop.f32.mrf.mxu0 }
 0x352   : > { %2467 = vst [vmem:[%s4562_s15 + $0xb0] sm:$0xff] %v2435_v62  ;;  %v2436_v60 = vmax.f32 %v2404_v14, 0.0  ;;  %v2405_v2 = vadd.f32 %v4544_v41, %v2361_v30  ;;  %v2362_v17 = vmul.f32 %v4547_v29, %v2305_v63  ;;  %v2309_v6 = vadd.f32 %v2308_v48, %v2148_v0 }
 0x353   : > { %v2310_v7 = vpop.f32.mrf.mxu0 }
 0x354   : > { %2468 = vst [vmem:[%s4562_s15 + $0xb8] sm:$0xff] %v2436_v60  ;;  %v2437_v44 = vmax.f32 %v2405_v2, 0.0  ;;  %v2406_v28 = vadd.f32 %v4554_v61, %v2362_v17  ;;  %v2363_v13 = vmul.f32 %v4541_v50, %v2309_v6  ;;  %v2311_v46 = vadd.f32 %v2310_v7, %v2150_v52 }
 0x355   : > { %v2314_v53 = vpop.f32.mrf.mxu0 }
 0x356   : > { %2469 = vst [vmem:[%s4562_s15 + $0xc0] sm:$0xff] %v2437_v44  ;;  %v2438_v1 = vmax.f32 %v2406_v28, 0.0  ;;  %v2407_v56 = vadd.f32 %v4544_v41, %v2363_v13  ;;  %v2364_v32 = vmul.f32 %v4547_v29, %v2311_v46  ;;  %v2315_v19 = vadd.f32 %v2314_v53, %v2154_v27 }
 0x357   : > { %v2316_v42 = vpop.f32.mrf.mxu0 }
 0x358   : > { %2470 = vst [vmem:[%s4562_s15 + $0xc8] sm:$0xff] %v2438_v1  ;;  %v2439_v49 = vmax.f32 %v2407_v56, 0.0  ;;  %v2408_v16 = vadd.f32 %v4554_v61, %v2364_v32  ;;  %v2365_v12 = vmul.f32 %v4541_v50, %v2315_v19  ;;  %v2317_v20 = vadd.f32 %v2316_v42, %v2156_v34 }
 0x359   : > { %v2320_v51 = vpop.f32.mrf.mxu0 }
 0x35a   : > { %2471 = vst [vmem:[%s4562_s15 + $0xd0] sm:$0xff] %v2439_v49  ;;  %v2440_v15 = vmax.f32 %v2408_v16, 0.0  ;;  %v2409_v8 = vadd.f32 %v4544_v41, %v2365_v12  ;;  %v2366_v4 = vmul.f32 %v4547_v29, %v2317_v20  ;;  %v2321_v58 = vadd.f32 %v2320_v51, %v2160_v47 }
 0x35b   : > { %v2322_v35 = vpop.f32.mrf.mxu0 }
 0x35c   : > { %2472 = vst [vmem:[%s4562_s15 + $0xd8] sm:$0xff] %v2440_v15  ;;  %v2441_v18 = vmax.f32 %v2409_v8, 0.0  ;;  %v2410_v43 = vadd.f32 %v4554_v61, %v2366_v4  ;;  %v2367_v26 = vmul.f32 %v4541_v50, %v2321_v58  ;;  %v2323_v39 = vadd.f32 %v2322_v35, %v2162_v54 }
 0x35e   : > { %2473 = vst [vmem:[%s4562_s15 + $0xe0] sm:$0xff] %v2441_v18  ;;  %v2442_v36 = vmax.f32 %v2410_v43, 0.0  ;;  %v2411_v25 = vadd.f32 %v4544_v41, %v2367_v26  ;;  %v2368_v9 = vmul.f32 %v4547_v29, %v2323_v39 }
 0x360   : > { %2474 = vst [vmem:[%s4562_s15 + $0xe8] sm:$0xff] %v2442_v36  ;;  %v2443_v10 = vmax.f32 %v2411_v25, 0.0  ;;  %v2412_v38 = vadd.f32 %v4554_v61, %v2368_v9 }
 0x362   : > { %2475 = vst [vmem:[%s4562_s15 + $0xf0] sm:$0xff] %v2443_v10  ;;  %v2444_v3 = vmax.f32 %v2412_v38, 0.0 }
 0x364   : > { %2476 = vst [vmem:[%s4562_s15 + $0xf8] sm:$0xff] %v2444_v3 }
 0x365 PF: > { %s19_s30 = sadd.s32 1, %s2657_s30  }
 0x366   : > { %p16_p4 = scmp.ge.s32.totalorder %s19_s30, 4  }
 0x368   :  { %18 = sbr.rel (!%p16_p4) target bundleno = 1 (0x1), region = 86 }

</bundles_post_ra>
